<compile_context>
chip_gen: v7x
topology: tpu7x:2x2x1
jax: 0.10.0
libtpu: 0.0.40
codegen_flags: <defaults>
</compile_context>

<pallas_src>
import functools

import numpy as np
import jax
import jax.numpy as jnp
from jax import lax
from jax.experimental import pallas as pl
from jax.experimental.pallas import tpu as pltpu


def _dfa_kernel(xq_ref, xk_ref, xv_ref, inter_ref, dist_ref, mask_ref,
                wqT_ref, wkT_ref, wvT_ref, weT_ref, beT_ref, wfc_ref,
                out_ref, attn_ref, qT_scr, kT_scr, vT_scr,
                *, d_q, d_k, d_v, compute_dtype, approx_recip):
    f32 = jnp.float32
    cd = compute_dtype
    h = pl.program_id(1)

    # ---- per-batch phase (head 0 only): full-width, lane-dense projections ----
    # Weights are stored [d_out, d_in]; activations [S, d_in]; contracting the
    # last dims of both gives transposed projections [d_out, S] that live in
    # f32 VMEM scratch across the whole head axis.
    @pl.when(h == 0)
    def _project():
        xq = xq_ref[0].astype(cd)        # residual input arrives in f32
        xk = xk_ref[0]
        xv = xv_ref[0]
        inter = inter_ref[0]
        dn_t = (((1,), (1,)), ((), ()))  # A[d_out, d_in] x B[S, d_in] -> [d_out, S]
        icT = jax.nn.sigmoid(
            lax.dot_general(weT_ref[...], inter, dn_t,
                            preferred_element_type=f32) + beT_ref[...])
        scaleT = icT + 1.0                                       # [d_model, S] f32
        qT_scr[...] = scaleT * lax.dot_general(
            wqT_ref[...], xq, dn_t, preferred_element_type=f32)
        kT_scr[...] = scaleT * lax.dot_general(
            wkT_ref[...], xk, dn_t, preferred_element_type=f32)
        vT_scr[...] = lax.dot_general(
            wvT_ref[...], xv, dn_t, preferred_element_type=f32)

    # ---- per-head attention ----
    qT_h = qT_scr[pl.ds(pl.multiple_of(h * d_q, d_q), d_q), :]   # [d_q, S]
    kT_h = kT_scr[pl.ds(pl.multiple_of(h * d_k, d_k), d_k), :]   # [d_k, S]
    vT_h = vT_scr[pl.ds(pl.multiple_of(h * d_v, d_v), d_v), :]   # [d_v, S]

    inv_sqrt_dk = f32(1.0 / float(np.sqrt(d_k)))
    # scores[i, j] = sum_d Q[i, d] * K[j, d] / sqrt(d_k)
    scores = lax.dot_general(qT_h.astype(cd), kT_h.astype(cd),
                             (((0,), (0,)), ((), ())),
                             preferred_element_type=f32) * inv_sqrt_dk
    scores = dist_ref[0].astype(f32) * scores
    scores = jnp.where(mask_ref[0] != 0, f32(-1e10), scores)    # torch masked_fill_

    m = jnp.max(scores, axis=-1, keepdims=True)
    e = jnp.exp(scores - m)
    denom = jnp.sum(e, axis=-1, keepdims=True)
    attn = e * pl.reciprocal(denom, approx=approx_recip)         # EUP reciprocal

    attn_ref[0, 0] = attn.astype(attn_ref.dtype)

    # context[i, d] = sum_j attn[i, j] * V[j, d]
    ctx = lax.dot_general(attn.astype(cd), vT_h.astype(cd),
                          (((1,), (1,)), ((), ())),
                          preferred_element_type=f32)            # [S, d_v]
    # This head's context straight through its fc slice -> lane-dense [S, d_model]
    contrib = jnp.dot(ctx.astype(cd), wfc_ref[0],
                      preferred_element_type=f32)

    @pl.when(h == 0)
    def _init_out():
        out_ref[0] = xq_ref[0].astype(f32) + contrib             # f32 residual + head 0

    @pl.when(h != 0)
    def _accumulate():
        out_ref[0] = out_ref[0] + contrib


def prepare_params(params, *, n_heads, d_v, compute_dtype=jnp.bfloat16):
    """One-time parameter preparation (keep out of the per-call forward path).

    `params` uses the [in_features, out_features] convention (y = x @ W);
    the kernel wants [out, in] weights so projections are lane-dense matmuls.
    """
    d_model = params["we"].shape[0]

    def cast(x):
        return jnp.asarray(x).astype(compute_dtype)

    return {
        "wqT": cast(params["wq"].T),                              # [H*d_q, d_model]
        "wkT": cast(params["wk"].T),                              # [H*d_k, d_model]
        "wvT": cast(params["wv"].T),                              # [H*d_v, d_model]
        "weT": cast(params["we"].T),                              # [d_model, d_model]
        "beT": jnp.asarray(params["be"], jnp.float32).reshape(d_model, 1),
        "wfc3": cast(params["wfc"]).reshape(n_heads, d_v, d_model),
    }


def distance_flowed_attention(input_Q, input_K, input_V, inter_info, dist_factor,
                              attn_mask, prepared, *, n_heads, d_q, d_k, d_v,
                              compute_dtype=jnp.bfloat16, attn_dtype=None,
                              vmem_limit_bytes=None):
    B, S, d_model = input_Q.shape
    if n_heads * d_q != d_model or n_heads * d_k != d_model:
        raise ValueError(
            "The (inter_coefficient + 1) gate multiplies the full [S, H*d] "
            "projection elementwise, so n_heads*d_q == n_heads*d_k == d_model "
            "is required (same constraint as the PyTorch module).")

    cd = np.dtype(compute_dtype)
    is_f32 = cd == np.dtype(np.float32)
    if attn_dtype is None:
        attn_dtype = jnp.float32 if is_f32 else jnp.bfloat16

    def cast(x):
        return x if x.dtype == cd else x.astype(cd)

    # input_Q stays f32: it feeds the residual add at full precision.
    xq = input_Q.astype(jnp.float32)
    xk = cast(input_K)
    xv = cast(input_V)
    inter = cast(inter_info)
    dist = cast(dist_factor)            # bf16 stream in bf16 mode (v5e HBM win)
    mask = attn_mask.astype(jnp.int8)

    if vmem_limit_bytes is None:
        try:
            cap = int(pltpu.get_tpu_info().vmem_capacity_bytes)
        except Exception:
            cap = 64 * 1024 * 1024
        # ~40 MiB on v7x (64 MiB physical), capped at 80 MiB on 128 MiB parts.
        vmem_limit_bytes = min(int(0.625 * cap), 80 * 1024 * 1024)

    kernel = functools.partial(_dfa_kernel, d_q=d_q, d_k=d_k, d_v=d_v,
                               compute_dtype=cd, approx_recip=not is_f32)

    in_specs = [
        pl.BlockSpec((1, S, d_model), lambda b, h: (b, 0, 0)),        # input_Q (f32)
        pl.BlockSpec((1, S, d_model), lambda b, h: (b, 0, 0)),        # input_K
        pl.BlockSpec((1, S, d_model), lambda b, h: (b, 0, 0)),        # input_V
        pl.BlockSpec((1, S, d_model), lambda b, h: (b, 0, 0)),        # inter_info
        pl.BlockSpec((1, S, S), lambda b, h: (b, 0, 0)),              # dist_factor
        pl.BlockSpec((1, S, S), lambda b, h: (b, 0, 0)),              # attn_mask int8
        pl.BlockSpec((n_heads * d_q, d_model), lambda b, h: (0, 0)),  # W_Q^T (full)
        pl.BlockSpec((n_heads * d_k, d_model), lambda b, h: (0, 0)),  # W_K^T (full)
        pl.BlockSpec((n_heads * d_v, d_model), lambda b, h: (0, 0)),  # W_V^T (full)
        pl.BlockSpec((d_model, d_model), lambda b, h: (0, 0)),        # W_e^T (full)
        pl.BlockSpec((d_model, 1), lambda b, h: (0, 0)),              # b_e^T
        pl.BlockSpec((1, d_v, d_model), lambda b, h: (h, 0, 0)),      # fc head slice
    ]
    out_specs = (
        pl.BlockSpec((1, S, d_model), lambda b, h: (b, 0, 0)),        # output (resident over heads)
        pl.BlockSpec((1, 1, S, S), lambda b, h: (b, h, 0, 0)),        # attn, per-head tile
    )
    out_shape = (
        jax.ShapeDtypeStruct((B, S, d_model), jnp.float32),
        jax.ShapeDtypeStruct((B, n_heads, S, S), attn_dtype),
    )
    scratch_shapes = [
        pltpu.VMEM((n_heads * d_q, S), jnp.float32),   # gated Q^T
        pltpu.VMEM((n_heads * d_k, S), jnp.float32),   # gated K^T
        pltpu.VMEM((n_heads * d_v, S), jnp.float32),   # V^T
    ]

    # Advisory cost estimate for XLA's scheduler.
    flops = (2 * B * S * d_model * (d_model + n_heads * (d_q + d_k + d_v))  # gate + projections
             + 2 * B * n_heads * (S * S * (d_k + d_v) + S * d_v * d_model))  # attn + fc
    transcendentals = B * S * d_model + B * n_heads * S * S                  # sigmoid + exp
    weights = (prepared["wqT"], prepared["wkT"], prepared["wvT"],
               prepared["weT"], prepared["beT"], prepared["wfc3"])
    bytes_accessed = int(
        sum(int(np.prod(a.shape)) * a.dtype.itemsize
            for a in (xq, xk, xv, inter, dist, mask) + weights)
        + B * S * d_model * 4
        + B * n_heads * S * S * np.dtype(attn_dtype).itemsize)

    return pl.pallas_call(
        kernel,
        out_shape=out_shape,
        grid_spec=pltpu.PrefetchScalarGridSpec(
            num_scalar_prefetch=0,
            grid=(B, n_heads),
            in_specs=in_specs,
            out_specs=out_specs,
            scratch_shapes=scratch_shapes,
        ),
        compiler_params=pltpu.CompilerParams(
            dimension_semantics=("parallel", "arbitrary"),
            vmem_limit_bytes=int(vmem_limit_bytes),
        ),
        cost_estimate=pl.CostEstimate(
            flops=int(flops),
            transcendentals=int(transcendentals),
            bytes_accessed=int(bytes_accessed),
        ),
    )(xq, xk, xv, inter, dist, mask, *weights)


def _reference(input_Q, input_K, input_V, inter_info, dist_factor, attn_mask, params,
               *, n_heads, d_q, d_k, d_v):
    B, S, d_model = input_Q.shape
    ic = jax.nn.sigmoid(inter_info @ params["we"] + params["be"])
    Q = ((ic + 1.0) * (input_Q @ params["wq"])).reshape(B, S, n_heads, d_q).transpose(0, 2, 1, 3)
    K = ((ic + 1.0) * (input_K @ params["wk"])).reshape(B, S, n_heads, d_k).transpose(0, 2, 1, 3)
    V = (input_V @ params["wv"]).reshape(B, S, n_heads, d_v).transpose(0, 2, 1, 3)
    scores = jnp.einsum("bhqd,bhkd->bhqk", Q, K) / np.sqrt(d_k)
    scores = dist_factor[:, None] * scores
    scores = jnp.where(attn_mask[:, None], -1e10, scores)
    attn = jax.nn.softmax(scores, axis=-1)
    ctx = jnp.einsum("bhqk,bhkd->bhqd", attn, V).transpose(0, 2, 1, 3).reshape(B, S, n_heads * d_v)
    return ctx @ params["wfc"] + input_Q, attn


if __name__ == "__main__":
    B, S, d_model, n_heads = 2, 8, 32, 4
    d_q = d_k = d_v = d_model // n_heads  # 8, so the (ic + 1) gate broadcast matches torch

    key = jax.random.PRNGKey(0)
    ks = jax.random.split(key, 12)

    def init(k, shape, fan_in):
        bound = 1.0 / np.sqrt(fan_in)
        return jax.random.uniform(k, shape, jnp.float32, -bound, bound)

    params = {
        "wq": init(ks[0], (d_model, n_heads * d_q), d_model),
        "wk": init(ks[1], (d_model, n_heads * d_k), d_model),
        "wv": init(ks[2], (d_model, n_heads * d_v), d_model),
        "wfc": init(ks[3], (n_heads * d_v, d_model), n_heads * d_v),
        "we": init(ks[4], (d_model, d_model), d_model),
        "be": init(ks[5], (1, d_model), d_model),
    }

    input_Q = jax.random.normal(ks[6], (B, S, d_model), jnp.float32)
    input_K = jax.random.normal(ks[7], (B, S, d_model), jnp.float32)
    input_V = jax.random.normal(ks[8], (B, S, d_model), jnp.float32)
    inter_info = jax.random.normal(ks[9], (B, S, d_model), jnp.float32)
    dist_factor = jax.random.uniform(ks[10], (B, S, S), jnp.float32, 0.5, 1.5)
    attn_mask = jnp.tile(jnp.triu(jnp.ones((S, S), jnp.bool_), k=1)[None], (B, 1, 1))

    ref_out, ref_attn = _reference(
        input_Q, input_K, input_V, inter_info, dist_factor, attn_mask, params,
        n_heads=n_heads, d_q=d_q, d_k=d_k, d_v=d_v)

    # f32 compute path: faithful to the torch module; tight check.
    prep32 = prepare_params(params, n_heads=n_heads, d_v=d_v, compute_dtype=jnp.float32)
    out32, attn32 = distance_flowed_attention(
        input_Q, input_K, input_V, inter_info, dist_factor, attn_mask, prep32,
        n_heads=n_heads, d_q=d_q, d_k=d_k, d_v=d_v, compute_dtype=jnp.float32)
    jax.block_until_ready((out32, attn32))
    np.testing.assert_allclose(np.asarray(out32), np.asarray(ref_out), rtol=1e-5, atol=1e-5)
    np.testing.assert_allclose(np.asarray(attn32), np.asarray(ref_attn), rtol=1e-5, atol=1e-5)

    # bf16 MXU path (production default): bf16 streams for dist/attn and bf16
    # MXU operands with f32 accumulation; loose sanity check only — structural
    # correctness is established by the f32 path above.
    prep16 = prepare_params(params, n_heads=n_heads, d_v=d_v, compute_dtype=jnp.bfloat16)
    out16, attn16 = distance_flowed_attention(
        input_Q, input_K, input_V, inter_info, dist_factor, attn_mask, prep16,
        n_heads=n_heads, d_q=d_q, d_k=d_k, d_v=d_v, compute_dtype=jnp.bfloat16)
    jax.block_until_ready((out16, attn16))
    np.testing.assert_allclose(np.asarray(out16), np.asarray(ref_out), rtol=1e-1, atol=1e-1)
    np.testing.assert_allclose(np.asarray(attn16, dtype=np.float32), np.asarray(ref_attn),
                               rtol=1e-1, atol=1e-1)

    print("KERNEL_OK")
</pallas_src>

<mosaic_0001>
module attributes {stable_mosaic.version = 11 : i64} {
  func.func @_dfa_kernel(%arg0: i32, %arg1: i32, %arg2: memref<1x8x32xf32, #tpu.memory_space<vmem>>, %arg3: memref<1x8x32xf32, #tpu.memory_space<vmem>>, %arg4: memref<1x8x32xf32, #tpu.memory_space<vmem>>, %arg5: memref<1x8x32xf32, #tpu.memory_space<vmem>>, %arg6: memref<1x8x8xf32, #tpu.memory_space<vmem>>, %arg7: memref<1x8x8xi8, #tpu.memory_space<vmem>>, %arg8: memref<32x32xf32, #tpu.memory_space<vmem>>, %arg9: memref<32x32xf32, #tpu.memory_space<vmem>>, %arg10: memref<32x32xf32, #tpu.memory_space<vmem>>, %arg11: memref<32x32xf32, #tpu.memory_space<vmem>>, %arg12: memref<32x1xf32, #tpu.memory_space<vmem>>, %arg13: memref<1x8x32xf32, #tpu.memory_space<vmem>>, %arg14: memref<1x8x32xf32, #tpu.memory_space<vmem>>, %arg15: memref<1x1x8x8xf32, #tpu.memory_space<vmem>>, %arg16: memref<32x8xf32, #tpu.memory_space<vmem>>, %arg17: memref<32x8xf32, #tpu.memory_space<vmem>>, %arg18: memref<32x8xf32, #tpu.memory_space<vmem>>) attributes {dimension_semantics = [#tpu.dimension_semantics<parallel>, #tpu.dimension_semantics<arbitrary>], iteration_bounds = array<i64: 2, 4>, scalar_prefetch = 0 : i64, scratch_operands = 3 : i64, tpu.core_type = #tpu.core_type<tc>, window_params = [{transform_indices = @transform_0, window_bounds = array<i64: 1, 8, 32>}, {transform_indices = @transform_1, window_bounds = array<i64: 1, 8, 32>}, {transform_indices = @transform_2, window_bounds = array<i64: 1, 8, 32>}, {transform_indices = @transform_3, window_bounds = array<i64: 1, 8, 32>}, {transform_indices = @transform_4, window_bounds = array<i64: 1, 8, 8>}, {transform_indices = @transform_5, window_bounds = array<i64: 1, 8, 8>}, {pipeline_mode = #tpu.pipeline_mode<synchronous>, transform_indices = @transform_6, window_bounds = array<i64: 32, 32>}, {pipeline_mode = #tpu.pipeline_mode<synchronous>, transform_indices = @transform_7, window_bounds = array<i64: 32, 32>}, {pipeline_mode = #tpu.pipeline_mode<synchronous>, transform_indices = @transform_8, window_bounds = array<i64: 32, 32>}, {pipeline_mode = #tpu.pipeline_mode<synchronous>, transform_indices = @transform_9, window_bounds = array<i64: 32, 32>}, {pipeline_mode = #tpu.pipeline_mode<synchronous>, transform_indices = @transform_10, window_bounds = array<i64: 32, 1>}, {transform_indices = @transform_11, window_bounds = array<i64: 1, 8, 32>}, {transform_indices = @transform_12, window_bounds = array<i64: 1, 8, 32>}, {transform_indices = @transform_13, window_bounds = array<i64: 1, 1, 8, 8>}]} {
    %c0_i32 = arith.constant 0 : i32
    %0 = arith.cmpi eq, %arg1, %c0_i32 : i32
    %1 = arith.extui %0 : i1 to i32
    %c0_i32_0 = arith.constant 0 : i32
    %2 = arith.cmpi ne, %1, %c0_i32_0 : i32
    scf.if %2 {
      %c0_28 = arith.constant 0 : index
      %c0_29 = arith.constant 0 : index
      %c0_30 = arith.constant 0 : index
      %50 = vector.load %arg2[%c0_28, %c0_29, %c0_30] : memref<1x8x32xf32, #tpu.memory_space<vmem>>, vector<1x8x32xf32>
      %51 = vector.shape_cast %50 : vector<1x8x32xf32> to vector<8x32xf32>
      %c0_31 = arith.constant 0 : index
      %c0_32 = arith.constant 0 : index
      %c0_33 = arith.constant 0 : index
      %52 = vector.load %arg3[%c0_31, %c0_32, %c0_33] : memref<1x8x32xf32, #tpu.memory_space<vmem>>, vector<1x8x32xf32>
      %53 = vector.shape_cast %52 : vector<1x8x32xf32> to vector<8x32xf32>
      %c0_34 = arith.constant 0 : index
      %c0_35 = arith.constant 0 : index
      %c0_36 = arith.constant 0 : index
      %54 = vector.load %arg4[%c0_34, %c0_35, %c0_36] : memref<1x8x32xf32, #tpu.memory_space<vmem>>, vector<1x8x32xf32>
      %55 = vector.shape_cast %54 : vector<1x8x32xf32> to vector<8x32xf32>
      %c0_37 = arith.constant 0 : index
      %c0_38 = arith.constant 0 : index
      %c0_39 = arith.constant 0 : index
      %56 = vector.load %arg5[%c0_37, %c0_38, %c0_39] : memref<1x8x32xf32, #tpu.memory_space<vmem>>, vector<1x8x32xf32>
      %57 = vector.shape_cast %56 : vector<1x8x32xf32> to vector<8x32xf32>
      %c0_40 = arith.constant 0 : index
      %c0_41 = arith.constant 0 : index
      %58 = vector.load %arg11[%c0_40, %c0_41] : memref<32x32xf32, #tpu.memory_space<vmem>>, vector<32x32xf32>
      %cst_42 = arith.constant dense<0.000000e+00> : vector<32x8xf32>
      %59 = tpu.matmul %58, %57, %cst_42 {dimension_numbers = #tpu.dot_dimension_numbers<[1], [1], [0], [0], [0, 0, 1, 0], [], []>} : vector<32x32xf32>, vector<8x32xf32>, vector<32x8xf32> -> vector<32x8xf32>
      %c0_43 = arith.constant 0 : index
      %c0_44 = arith.constant 0 : index
      %60 = vector.load %arg12[%c0_43, %c0_44] : memref<32x1xf32, #tpu.memory_space<vmem>>, vector<32x1xf32>
      %61 = vector.broadcast %60 : vector<32x1xf32> to vector<32x8xf32>
      %62 = arith.addf %59, %61 : vector<32x8xf32>
      %63 = arith.negf %62 : vector<32x8xf32>
      %64 = math.exp %63 : vector<32x8xf32>
      %cst_45 = arith.constant 1.000000e+00 : f32
      %65 = vector.broadcast %cst_45 : f32 to vector<32x8xf32>
      %66 = arith.addf %65, %64 : vector<32x8xf32>
      %67 = arith.divf %65, %66 : vector<32x8xf32>
      %cst_46 = arith.constant 1.000000e+00 : f32
      %68 = vector.broadcast %cst_46 : f32 to vector<32x8xf32>
      %69 = arith.addf %67, %68 : vector<32x8xf32>
      %c0_47 = arith.constant 0 : index
      %c0_48 = arith.constant 0 : index
      %70 = vector.load %arg8[%c0_47, %c0_48] : memref<32x32xf32, #tpu.memory_space<vmem>>, vector<32x32xf32>
      %cst_49 = arith.constant dense<0.000000e+00> : vector<32x8xf32>
      %71 = tpu.matmul %70, %51, %cst_49 {dimension_numbers = #tpu.dot_dimension_numbers<[1], [1], [0], [0], [0, 0, 1, 0], [], []>} : vector<32x32xf32>, vector<8x32xf32>, vector<32x8xf32> -> vector<32x8xf32>
      %72 = arith.mulf %69, %71 : vector<32x8xf32>
      %c0_50 = arith.constant 0 : index
      %c0_51 = arith.constant 0 : index
      %73 = vector.load %arg16[%c0_50, %c0_51] : memref<32x8xf32, #tpu.memory_space<vmem>>, vector<32x8xf32>
      tpu.vector_store %arg16[%c0_50, %c0_51], %72 {strides = array<i32>} : memref<32x8xf32, #tpu.memory_space<vmem>>, vector<32x8xf32>,
      %c0_52 = arith.constant 0 : index
      %c0_53 = arith.constant 0 : index
      %74 = vector.load %arg9[%c0_52, %c0_53] : memref<32x32xf32, #tpu.memory_space<vmem>>, vector<32x32xf32>
      %cst_54 = arith.constant dense<0.000000e+00> : vector<32x8xf32>
      %75 = tpu.matmul %74, %53, %cst_54 {dimension_numbers = #tpu.dot_dimension_numbers<[1], [1], [0], [0], [0, 0, 1, 0], [], []>} : vector<32x32xf32>, vector<8x32xf32>, vector<32x8xf32> -> vector<32x8xf32>
      %76 = arith.mulf %69, %75 : vector<32x8xf32>
      %c0_55 = arith.constant 0 : index
      %c0_56 = arith.constant 0 : index
      %77 = vector.load %arg17[%c0_55, %c0_56] : memref<32x8xf32, #tpu.memory_space<vmem>>, vector<32x8xf32>
      tpu.vector_store %arg17[%c0_55, %c0_56], %76 {strides = array<i32>} : memref<32x8xf32, #tpu.memory_space<vmem>>, vector<32x8xf32>,
      %c0_57 = arith.constant 0 : index
      %c0_58 = arith.constant 0 : index
      %78 = vector.load %arg10[%c0_57, %c0_58] : memref<32x32xf32, #tpu.memory_space<vmem>>, vector<32x32xf32>
      %cst_59 = arith.constant dense<0.000000e+00> : vector<32x8xf32>
      %79 = tpu.matmul %78, %55, %cst_59 {dimension_numbers = #tpu.dot_dimension_numbers<[1], [1], [0], [0], [0, 0, 1, 0], [], []>} : vector<32x32xf32>, vector<8x32xf32>, vector<32x8xf32> -> vector<32x8xf32>
      %c0_60 = arith.constant 0 : index
      %c0_61 = arith.constant 0 : index
      %80 = vector.load %arg18[%c0_60, %c0_61] : memref<32x8xf32, #tpu.memory_space<vmem>>, vector<32x8xf32>
      tpu.vector_store %arg18[%c0_60, %c0_61], %79 {strides = array<i32>} : memref<32x8xf32, #tpu.memory_space<vmem>>, vector<32x8xf32>,
    } else {
    }
    %c8_i32 = arith.constant 8 : i32
    %3 = arith.muli %arg1, %c8_i32 : i32
    %4 = tpu.assume_multiple %3, 8 : i32
    %5 = arith.index_cast %4 : i32 to index
    %c0 = arith.constant 0 : index
    %6 = vector.load %arg16[%5, %c0] : memref<32x8xf32, #tpu.memory_space<vmem>>, vector<8x8xf32>
    %c8_i32_1 = arith.constant 8 : i32
    %7 = arith.muli %arg1, %c8_i32_1 : i32
    %8 = tpu.assume_multiple %7, 8 : i32
    %9 = arith.index_cast %8 : i32 to index
    %c0_2 = arith.constant 0 : index
    %10 = vector.load %arg17[%9, %c0_2] : memref<32x8xf32, #tpu.memory_space<vmem>>, vector<8x8xf32>
    %c8_i32_3 = arith.constant 8 : i32
    %11 = arith.muli %arg1, %c8_i32_3 : i32
    %12 = tpu.assume_multiple %11, 8 : i32
    %13 = arith.index_cast %12 : i32 to index
    %c0_4 = arith.constant 0 : index
    %14 = vector.load %arg18[%13, %c0_4] : memref<32x8xf32, #tpu.memory_space<vmem>>, vector<8x8xf32>
    %cst = arith.constant dense<0.000000e+00> : vector<8x8xf32>
    %15 = tpu.matmul %6, %10, %cst {dimension_numbers = #tpu.dot_dimension_numbers<[0], [0], [1], [1], [0, 1, 1, 1], [], []>} : vector<8x8xf32>, vector<8x8xf32>, vector<8x8xf32> -> vector<8x8xf32>
    %cst_5 = arith.constant 0.353553385 : f32
    %16 = vector.broadcast %cst_5 : f32 to vector<8x8xf32>
    %17 = arith.mulf %15, %16 : vector<8x8xf32>
    %c0_6 = arith.constant 0 : index
    %c0_7 = arith.constant 0 : index
    %c0_8 = arith.constant 0 : index
    %18 = vector.load %arg6[%c0_6, %c0_7, %c0_8] : memref<1x8x8xf32, #tpu.memory_space<vmem>>, vector<1x8x8xf32>
    %19 = vector.shape_cast %18 : vector<1x8x8xf32> to vector<8x8xf32>
    %20 = arith.mulf %19, %17 : vector<8x8xf32>
    %c0_9 = arith.constant 0 : index
    %c0_10 = arith.constant 0 : index
    %c0_11 = arith.constant 0 : index
    %21 = vector.load %arg7[%c0_9, %c0_10, %c0_11] : memref<1x8x8xi8, #tpu.memory_space<vmem>>, vector<1x8x8xi8>
    %22 = vector.shape_cast %21 : vector<1x8x8xi8> to vector<8x8xi8>
    %c0_i8 = arith.constant 0 : i8
    %23 = vector.broadcast %c0_i8 : i8 to vector<8x8xi8>
    %24 = arith.cmpi ne, %22, %23 : vector<8x8xi8>
    %cst_12 = arith.constant -1.000000e+10 : f32
    %25 = vector.broadcast %cst_12 : f32 to vector<8x8xf32>
    %26 = arith.select %24, %25, %20 : vector<8x8xi1>, vector<8x8xf32>
    %cst_13 = arith.constant dense<0xFF800000> : vector<8xf32>
    %27 = vector.multi_reduction <maximumf>, %26, %cst_13 [1] : vector<8x8xf32> to vector<8xf32>
    %28 = vector.shape_cast %27 : vector<8xf32> to vector<8x1xf32>
    %29 = vector.broadcast %28 : vector<8x1xf32> to vector<8x8xf32>
    %30 = arith.subf %26, %29 : vector<8x8xf32>
    %31 = math.exp %30 : vector<8x8xf32>
    %cst_14 = arith.constant dense<0.000000e+00> : vector<8xf32>
    %32 = vector.multi_reduction <add>, %31, %cst_14 [1] : vector<8x8xf32> to vector<8xf32>
    %33 = vector.shape_cast %32 : vector<8xf32> to vector<8x1xf32>
    %34 = tpu.reciprocal %33 : vector<8x1xf32> -> vector<8x1xf32>
    %35 = vector.broadcast %34 : vector<8x1xf32> to vector<8x8xf32>
    %36 = arith.mulf %31, %35 : vector<8x8xf32>
    %c0_15 = arith.constant 0 : index
    %c0_16 = arith.constant 0 : index
    %c0_17 = arith.constant 0 : index
    %c0_18 = arith.constant 0 : index
    %37 = vector.load %arg15[%c0_15, %c0_16, %c0_17, %c0_18] : memref<1x1x8x8xf32, #tpu.memory_space<vmem>>, vector<1x1x8x8xf32>
    %38 = vector.shape_cast %37 : vector<1x1x8x8xf32> to vector<8x8xf32>
    %39 = vector.shape_cast %36 : vector<8x8xf32> to vector<1x1x8x8xf32>
    tpu.vector_store %arg15[%c0_15, %c0_16, %c0_17, %c0_18], %39 {strides = array<i32>} : memref<1x1x8x8xf32, #tpu.memory_space<vmem>>, vector<1x1x8x8xf32>,
    %cst_19 = arith.constant dense<0.000000e+00> : vector<8x8xf32>
    %40 = tpu.matmul %36, %14, %cst_19 {dimension_numbers = #tpu.dot_dimension_numbers<[1], [1], [0], [0], [0, 0, 1, 0], [], []>} : vector<8x8xf32>, vector<8x8xf32>, vector<8x8xf32> -> vector<8x8xf32>
    %c0_20 = arith.constant 0 : index
    %c0_21 = arith.constant 0 : index
    %c0_22 = arith.constant 0 : index
    %41 = vector.load %arg13[%c0_20, %c0_21, %c0_22] : memref<1x8x32xf32, #tpu.memory_space<vmem>>, vector<1x8x32xf32>
    %42 = vector.shape_cast %41 : vector<1x8x32xf32> to vector<8x32xf32>
    %cst_23 = arith.constant dense<0.000000e+00> : vector<8x32xf32>
    %43 = tpu.matmul %40, %42, %cst_23 {dimension_numbers = #tpu.dot_dimension_numbers<[1], [0], [0], [1], [0, 0, 1, 1], [], []>} : vector<8x8xf32>, vector<8x32xf32>, vector<8x32xf32> -> vector<8x32xf32>
    %c0_i32_24 = arith.constant 0 : i32
    %44 = arith.cmpi eq, %arg1, %c0_i32_24 : i32
    %45 = arith.extui %44 : i1 to i32
    %c0_i32_25 = arith.constant 0 : i32
    %46 = arith.cmpi ne, %45, %c0_i32_25 : i32
    scf.if %46 {
      %c0_28 = arith.constant 0 : index
      %c0_29 = arith.constant 0 : index
      %c0_30 = arith.constant 0 : index
      %50 = vector.load %arg2[%c0_28, %c0_29, %c0_30] : memref<1x8x32xf32, #tpu.memory_space<vmem>>, vector<1x8x32xf32>
      %51 = vector.shape_cast %50 : vector<1x8x32xf32> to vector<8x32xf32>
      %52 = arith.addf %51, %43 : vector<8x32xf32>
      %c0_31 = arith.constant 0 : index
      %c0_32 = arith.constant 0 : index
      %c0_33 = arith.constant 0 : index
      %53 = vector.load %arg14[%c0_31, %c0_32, %c0_33] : memref<1x8x32xf32, #tpu.memory_space<vmem>>, vector<1x8x32xf32>
      %54 = vector.shape_cast %53 : vector<1x8x32xf32> to vector<8x32xf32>
      %55 = vector.shape_cast %52 : vector<8x32xf32> to vector<1x8x32xf32>
      tpu.vector_store %arg14[%c0_31, %c0_32, %c0_33], %55 {strides = array<i32>} : memref<1x8x32xf32, #tpu.memory_space<vmem>>, vector<1x8x32xf32>,
    } else {
    }
    %c0_i32_26 = arith.constant 0 : i32
    %47 = arith.cmpi ne, %arg1, %c0_i32_26 : i32
    %48 = arith.extui %47 : i1 to i32
    %c0_i32_27 = arith.constant 0 : i32
    %49 = arith.cmpi ne, %48, %c0_i32_27 : i32
    scf.if %49 {
      %c0_28 = arith.constant 0 : index
      %c0_29 = arith.constant 0 : index
      %c0_30 = arith.constant 0 : index
      %50 = vector.load %arg14[%c0_28, %c0_29, %c0_30] : memref<1x8x32xf32, #tpu.memory_space<vmem>>, vector<1x8x32xf32>
      %51 = vector.shape_cast %50 : vector<1x8x32xf32> to vector<8x32xf32>
      %52 = arith.addf %51, %43 : vector<8x32xf32>
      %c0_31 = arith.constant 0 : index
      %c0_32 = arith.constant 0 : index
      %c0_33 = arith.constant 0 : index
      %53 = vector.load %arg14[%c0_31, %c0_32, %c0_33] : memref<1x8x32xf32, #tpu.memory_space<vmem>>, vector<1x8x32xf32>
      %54 = vector.shape_cast %53 : vector<1x8x32xf32> to vector<8x32xf32>
      %55 = vector.shape_cast %52 : vector<8x32xf32> to vector<1x8x32xf32>
      tpu.vector_store %arg14[%c0_31, %c0_32, %c0_33], %55 {strides = array<i32>} : memref<1x8x32xf32, #tpu.memory_space<vmem>>, vector<1x8x32xf32>,
    } else {
    }
    return
  }
  func.func @transform_0(%arg0: i32, %arg1: i32) -> (i32, i32, i32) {
    %c0_i32 = arith.constant 0 : i32
    %c0_i32_0 = arith.constant 0 : i32
    %c0_i32_1 = arith.constant 0 : i32
    return %arg0, %c0_i32, %c0_i32_0 : i32, i32, i32
  }
  func.func @transform_1(%arg0: i32, %arg1: i32) -> (i32, i32, i32) {
    %c0_i32 = arith.constant 0 : i32
    %c0_i32_0 = arith.constant 0 : i32
    %c0_i32_1 = arith.constant 0 : i32
    return %arg0, %c0_i32, %c0_i32_0 : i32, i32, i32
  }
  func.func @transform_2(%arg0: i32, %arg1: i32) -> (i32, i32, i32) {
    %c0_i32 = arith.constant 0 : i32
    %c0_i32_0 = arith.constant 0 : i32
    %c0_i32_1 = arith.constant 0 : i32
    return %arg0, %c0_i32, %c0_i32_0 : i32, i32, i32
  }
  func.func @transform_3(%arg0: i32, %arg1: i32) -> (i32, i32, i32) {
    %c0_i32 = arith.constant 0 : i32
    %c0_i32_0 = arith.constant 0 : i32
    %c0_i32_1 = arith.constant 0 : i32
    return %arg0, %c0_i32, %c0_i32_0 : i32, i32, i32
  }
  func.func @transform_4(%arg0: i32, %arg1: i32) -> (i32, i32, i32) {
    %c0_i32 = arith.constant 0 : i32
    %c0_i32_0 = arith.constant 0 : i32
    %c0_i32_1 = arith.constant 0 : i32
    return %arg0, %c0_i32, %c0_i32_0 : i32, i32, i32
  }
  func.func @transform_5(%arg0: i32, %arg1: i32) -> (i32, i32, i32) {
    %c0_i32 = arith.constant 0 : i32
    %c0_i32_0 = arith.constant 0 : i32
    %c0_i32_1 = arith.constant 0 : i32
    return %arg0, %c0_i32, %c0_i32_0 : i32, i32, i32
  }
  func.func @transform_6(%arg0: i32, %arg1: i32) -> (i32, i32) {
    %c0_i32 = arith.constant 0 : i32
    %c0_i32_0 = arith.constant 0 : i32
    %c0_i32_1 = arith.constant 0 : i32
    return %c0_i32, %c0_i32_0 : i32, i32
  }
  func.func @transform_7(%arg0: i32, %arg1: i32) -> (i32, i32) {
    %c0_i32 = arith.constant 0 : i32
    %c0_i32_0 = arith.constant 0 : i32
    %c0_i32_1 = arith.constant 0 : i32
    return %c0_i32, %c0_i32_0 : i32, i32
  }
  func.func @transform_8(%arg0: i32, %arg1: i32) -> (i32, i32) {
    %c0_i32 = arith.constant 0 : i32
    %c0_i32_0 = arith.constant 0 : i32
    %c0_i32_1 = arith.constant 0 : i32
    return %c0_i32, %c0_i32_0 : i32, i32
  }
  func.func @transform_9(%arg0: i32, %arg1: i32) -> (i32, i32) {
    %c0_i32 = arith.constant 0 : i32
    %c0_i32_0 = arith.constant 0 : i32
    %c0_i32_1 = arith.constant 0 : i32
    return %c0_i32, %c0_i32_0 : i32, i32
  }
  func.func @transform_10(%arg0: i32, %arg1: i32) -> (i32, i32) {
    %c0_i32 = arith.constant 0 : i32
    %c0_i32_0 = arith.constant 0 : i32
    %c0_i32_1 = arith.constant 0 : i32
    return %c0_i32, %c0_i32_0 : i32, i32
  }
  func.func @transform_11(%arg0: i32, %arg1: i32) -> (i32, i32, i32) {
    %c0_i32 = arith.constant 0 : i32
    %c0_i32_0 = arith.constant 0 : i32
    %c0_i32_1 = arith.constant 0 : i32
    return %arg1, %c0_i32, %c0_i32_0 : i32, i32, i32
  }
  func.func @transform_12(%arg0: i32, %arg1: i32) -> (i32, i32, i32) {
    %c0_i32 = arith.constant 0 : i32
    %c0_i32_0 = arith.constant 0 : i32
    %c0_i32_1 = arith.constant 0 : i32
    return %arg0, %c0_i32, %c0_i32_0 : i32, i32, i32
  }
  func.func @transform_13(%arg0: i32, %arg1: i32) -> (i32, i32, i32, i32) {
    %c0_i32 = arith.constant 0 : i32
    %c0_i32_0 = arith.constant 0 : i32
    %c0_i32_1 = arith.constant 0 : i32
    return %arg0, %arg1, %c0_i32, %c0_i32_0 : i32, i32, i32, i32
  }
}

</mosaic_0001>

<bundles_post_ra>
// kernel: tpu_custom_call.1
= control target key start
LH: loop header
LB: loop body
LE: loop exit
PB: predicated region body
PF: predicated region fallthrough
CT: control target
= control target key end

     0   :  { %s3468_s0 = inlined_call_operand.hbm [shape: f32[2,8,32], index: 0, kind: input, shape index: {}]   ;;  %s3469_s1 = inlined_call_operand.hbm [shape: f32[2,8,32], index: 1, kind: input, shape index: {}]   ;;  %s3470_s2 = inlined_call_operand.hbm [shape: f32[2,8,32], index: 2, kind: input, shape index: {}]   ;;  %s3471_s3 = inlined_call_operand.hbm [shape: f32[2,8,32], index: 3, kind: input, shape index: {}]   ;;  %s3472_s4 = inlined_call_operand.hbm [shape: f32[2,8,8], index: 4, kind: input, shape index: {}]   ;;  %s3473_s5 = inlined_call_operand.hbm [shape: s8[2,8,8], index: 5, kind: input, shape index: {}]   ;;  %s3474_s6 = inlined_call_operand.vmem [shape: f32[32,32], index: 6, kind: input, shape index: {}]   ;;  %s3475_s7 = inlined_call_operand.hbm [shape: f32[32,32], index: 7, kind: input, shape index: {}]   ;;  %s3476_s8 = inlined_call_operand.hbm [shape: f32[32,32], index: 8, kind: input, shape index: {}]   ;;  %s3477_s9 = inlined_call_operand.vmem [shape: f32[32,32], index: 9, kind: input, shape index: {}]   ;;  %s3478_s10 = inlined_call_operand.vmem [shape: f32[32,1], index: 10, kind: input, shape index: {}]   ;;  %s3479_s11 = inlined_call_operand.hbm [shape: f32[4,8,32], index: 11, kind: input, shape index: {}]   ;;  %s3480_s12 = inlined_call_operand.hbm [shape: f32[2,8,32], index: 12, kind: output, shape index: {0}]   ;;  %s3481_s13 = inlined_call_operand.hbm [shape: f32[2,4,8,8], index: 13, kind: output, shape index: {1}]  }
   0x1   :  { %3533 = sst [smem:[#allocation45_spill]] %s3468_s0 }
   0x2   :  { %3534 = sst [smem:[#allocation46_spill]] %s3469_s1 }
   0x3   :  { %3535 = sst [smem:[#allocation47_spill]] %s3470_s2 }
   0x4   :  { %3536 = sst [smem:[#allocation48_spill]] %s3471_s3 }
   0x5   :  { %3537 = sst [smem:[#allocation49_spill]] %s3472_s4 }
   0x6   :  { %3538 = sst [smem:[#allocation50_spill]] %s3473_s5 }
   0x7   :  { %3539 = sst [smem:[#allocation51_spill]] %s3474_s6 }
   0x8   :  { %3540 = sst [smem:[#allocation52_spill]] %s3475_s7 }
   0x9   :  { %3541 = sst [smem:[#allocation53_spill]] %s3476_s8 }
   0xa   :  { %3542 = sst [smem:[#allocation54_spill]] %s3477_s9 }
   0xb   :  { %3543 = sst [smem:[#allocation55_spill]] %s3478_s10 }
   0xc   :  { %3544 = sst [smem:[#allocation56_spill]] %s3479_s11 }
   0xd   :  { %3545 = sst [smem:[#allocation57_spill]] %s3480_s12 }
   0xe   :  { %3546 = sst [smem:[#allocation58_spill]] %s3481_s13 }
   0xf   :  { %19 = vsyncpa [#allocation6], 0 }
  0x10   :  { %21 = vsyncpa [#allocation6 + $0x1], 0 }
  0x11   :  { %22 = vsyncpa [#allocation9], 0 }
  0x12   :  { %24 = vsyncpa [#allocation9 + $0x1], 0 }
  0x13   :  { %25 = vsyncpa [#allocation12], 0 }
  0x14   :  { %27 = vsyncpa [#allocation12 + $0x1], 0 }
  0x15   :  { %28 = vsyncpa [#allocation15], 0 }
  0x16   :  { %30 = vsyncpa [#allocation15 + $0x1], 0 }
  0x17   :  { %31 = vsyncpa [#allocation18], 0 }
  0x18   :  { %32 = vsyncpa [#allocation7], 0 }
  0x19   :  { %34 = vsyncpa [#allocation7 + $0x1], 0 }
  0x1a   :  { %35 = vsyncpa [#allocation22], 0 }
  0x1b   :  { %37 = vsyncpa [#allocation22 + $0x1], 0  ;;  %s2736_s25 = smov 0   ;;  %s2738_s26 = smov 0  }
  0x1c   :  { %3547 = sst [smem:[#allocation32_spill]] %s2738_s26  ;;  %s2740_s27 = smov 0  }
  0x1d   :  { %s2742_s28 = smov 0   ;;  %s2744_s29 = smov 0  }
  0x1e   :  { %s2746_s30 = smov 0   ;;  %s2748_s14 = smov 0  }
  0x1f   :  { %s2750_s15 = smov 0   ;;  %s2752_s16 = smov 0  }
  0x20   :  { %s2754_s17 = smov 0   ;;  %s2756_s18 = smov 0  }
  0x21   :  { %s2758_s19 = smov 0   ;;  %s2760_s20 = smov 0  }
  0x22   :  { %s2762_s21 = smov 0  }
  0x23 LB: > { %s3549_s26 = sld [smem:[#allocation32_spill]]  ;;  %3552 = sst [smem:[#allocation34_spill]] %s2603_s27  ;;  %s2647_s21 = sphi %s2762_s21, %s43_s21   ;;  %s2643_s20 = sphi %s2760_s20, %s3661_s20   ;;  %s2639_s19 = sphi %s2758_s19, %s3660_s19   ;;  %s2635_s18 = sphi %s2756_s18, %s3659_s18   ;;  %s2631_s17 = sphi %s2754_s17, %s3658_s17   ;;  %s2627_s16 = sphi %s2752_s16, %s3657_s16   ;;  %s2623_s15 = sphi %s2750_s15, %s3656_s15   ;;  %s2619_s14 = sphi %s2748_s14, %s3650_s14   ;;  %s2615_s30 = sphi %s2746_s30, %s3655_s30   ;;  %s2611_s29 = sphi %s2744_s29, %s3654_s29   ;;  %s2607_s28 = sphi %s2742_s28, %s3653_s28   ;;  %s2603_s27 = sphi %s2740_s27, %s3652_s27   ;;  %s2595_s25 = sphi %s2736_s25, %s3648_s25  }
  0x24   : > { %3550 = sst [smem:[#allocation32_spill]] %s2595_s25  ;;  %s2807_s22 = sadd.s32 4294967295, %s2647_s21  }
  0x25   : > { %3553 = sst [smem:[#allocation35_spill]] %s2619_s14  ;;  %s1826_s23 = sadd.s32 4294967294, %s2647_s21  }
  0x26   : > { %3554 = sst [smem:[#allocation36_spill]] %s2623_s15  ;;  %p75_p0 = scmp.ne.s32.totalorder %s2623_s15, %s2619_s14 }
  0x27   : > { %3555 = sst [smem:[#allocation37_spill]] %s2631_s17  ;;  %p3498_p1 = scmp.eq.s32.totalorder %s2807_s22, 0 }
  0x28   : > { %3556 = sst [smem:[#allocation38_spill]] %s2635_s18  ;;  %p3499_p2 = scmp.eq.s32.totalorder %s2807_s22, 7 }
  0x29   : > { %3551 = sst [smem:[#allocation33_spill]] %s3549_s26  ;;  %p366_p3 = scmp.eq.s32.totalorder %s1826_s23, 7 }
  0x2a   : > { %p2816_p4 = por %p3498_p1, %p75_p0  ;;  %p387_p5 = scmp.ne.s32.totalorder %s2603_s27, %s3549_s26 }
  0x2b   : > { %p2822_p6 = por %p366_p3, %p75_p0  ;;  %p393_p7 = scmp.ne.s32.totalorder %s3549_s26, %s2595_s25 }
  0x2c   : > { %s3557_s24 = scalar_select %p2816_p4, 1, 0 }
  0x2d   : > { %s3559_s13 = scalar_select %p2822_p6, 1, 0 }
  0x2e   : > { %3558 = sst [smem:[#allocation39_spill]] %s3557_s24  ;;  %p2830_p8 = por %p387_p5, %p3499_p2 }
  0x2f   : > { %3560 = sst [smem:[#allocation40_spill]] %s3559_s13  ;;  %p1827_p9 = scmp.ge.s32.totalorder %s2647_s21, 1 }
  0x30   : > { %s3561_s12 = scalar_select %p2830_p8, 1, 0 }
  0x31   : > { %p2835_p10 = por %p393_p7, %p366_p3  ;;  %p401_p11 = scmp.lt.s32.totalorder %s2647_s21, 9 }
  0x32   : > { %3562 = sst [smem:[#allocation41_spill]] %s3561_s12  ;;  %s2649_s18 = smov [#allocation16]  }
  0x33   : > { %s3563_s14 = scalar_select %p2835_p10, 1, 0 }
  0x34   : > { %p2840_p12 = pnand %p1827_p9, %p401_p11  ;;  %s416_s10 = sshll.u32 %s2649_s18, 4  ;;  %s417_s10 = int_to_ptr.vmem [resolvable:$true] %s416_s10 }
  0x35   : > { %3564 = sst [smem:[#allocation42_spill]] %s3563_s14  ;;  %s3568_s7 = sld [smem:[#allocation52_spill]] }
  0x36   : > { %s3565_s23 = scalar_select %p2840_p12, 1, 0 }
  0x37   : > { %p1995_p13 = pneg %p2840_p12 }
  0x38   : > { %3566 = sst [smem:[#allocation43_spill]] %s3565_s23 }
  0x39   : > { %p2848_p0 = pnand %p1995_p13, %p3498_p1 }
  0x3b   : > { %s3567_s25 = scalar_select %p2848_p0, 1, 0 }
  0x3c   : > { %s2179_s6 = scalar_lea.hbm %s3568_s7, 512  ;;  %p3515_p5 = pneg %p2848_p0 }
  0x3d   : > { %p2180_p3 = scmp.ne.s32.totalorder %s3568_s7, %s2179_s6  ;;  %p2186_p11 = scmp.lt.u32.totalorder %s2179_s6, %s3568_s7 }
  0x3f   : > { %p2182_p7 = pnand %p3515_p5, %p2180_p3 }
  0x41   : > { %p2183_p9 = pneg %p2182_p7 }
  0x43   : > { %p2188_p13 = pnand %p2186_p11, %p2183_p9 }
  0x45   : > { %2191 = shalt.err (!%p2188_p13)
}
  0x46   : > { %s2192_s13 = scalar_lea.vmem %s417_s10, 512  ;;  %p2200_p6 = scmp.lt.s32.totalorder %s417_s10, %s417_s10 }
  0x47   : > { %p2193_p1 = scmp.ne.s32.totalorder %s417_s10, %s2192_s13  ;;  %p2201_p8 = scmp.lt.s32.totalorder %s2192_s13, %s2192_s13 }
  0x49   : > { %p2195_p2 = pnand %p2193_p1, %p3515_p5  ;;  %p2202_p4 = por %p2201_p8, %p2200_p6 }
  0x4b   : > { %p2196_p10 = pneg %p2195_p2 }
  0x4d   : > { %p2203_p12 = pnand %p2202_p4, %p2196_p10 }
  0x4f   : > { %2206 = shalt.err (!%p2203_p12)
}
  0x50   : > { %s3503_s9 = smov 128   ;;  %s3504_s6 = smov 8  }
  0x51   : > { %1998 = dma.hbm_to_vmem [thread:$0]  (!%p2848_p0), %s3568_s7, 512, %s417_s10, [#allocation15], %s3503_s9, %s3503_s9, %s3504_s6  }
  0x52   : > { %p69_p1 = scmp.ne.s32.totalorder %s2627_s16, %s2623_s15  ;;  %p3514_p2 = scmp.eq.s32.totalorder %s2647_s21, 0 }
  0x53   : > { %p3513_p4 = scmp.lt.s32.totalorder %s2647_s21, 8  ;;  %s2883_s26 = sand.u32 1, %s2647_s21  }
  0x54   : > { %p71_p6 = por %p3514_p2, %p69_p1  ;;  %p3569_p8 = scmp.eq.s32.totalorder %s2807_s22, 7 }
  0x55   : > { %s3507_s17 = sand.u32 1, %s2627_s16   ;;  %s2899_s12 = sshll.u32 %s2643_s20, 7 }
  0x56   : > { %p2889_p10 = por %p3569_p8, %p69_p1  ;;  %s2896_s18 = sshll.u32 %s3507_s17, 3 }
  0x57   : > { %s3572_s0 = sld [smem:[#allocation45_spill]]  ;;  %s453_s6 = scalar_lea.vmem [#allocation5], %s2896_s18 }
  0x58   : > { %s3570_s14 = scalar_select %p2889_p10, 1, 0 }
  0x59   : > { %s460_s7 = sshll.u32 %s453_s6, 4  ;;  %p2910_p12 = pnand %p3513_p4, %p71_p6  ;;  %s2914_s7 = int_to_ptr.vmem [resolvable:$true] %s460_s7 }
  0x5a   : > { %3571 = sst [smem:[#allocation44_spill]] %s3570_s14 }
  0x5b   : > { %s3573_s14 = scalar_select %p2910_p12, 1, 0 }
  0x5c   : > { %p2921_p7 = pneg %p2910_p12 }
  0x5d   : > { %s2905_s9 = scalar_lea.hbm %s3572_s0, %s2899_s12  ;;  %s2212_s15 = scalar_lea.hbm %s3572_s0, 256 }
  0x5e   : > { %s2207_s24 = scalar_lea.hbm %s2905_s9, 128  ;;  %p2213_p13 = scmp.lt.u32.totalorder %s2905_s9, %s3572_s0 }
  0x5f   : > { %p2208_p3 = scmp.ne.s32.totalorder %s2905_s9, %s2207_s24  ;;  %p2214_p1 = scmp.lt.u32.totalorder %s2212_s15, %s2207_s24 }
  0x60   : > { %s3574_s10 = scalar_select %p2921_p7, 1, 0 }
  0x61   : > { %p2210_p9 = pnand %p2921_p7, %p2208_p3  ;;  %p2215_p6 = por %p2214_p1, %p2213_p13 }
  0x62   : > { %p2216_p8 = scmp.lt.u32.totalorder %s2207_s24, %s2905_s9 }
  0x63   : > { %p2211_p11 = pneg %p2210_p9 }
  0x64   : > { %p2217_p4 = por %p2216_p8, %p2215_p6 }
  0x66   : > { %p2218_p2 = pnand %p2217_p4, %p2211_p11 }
  0x68   : > { %2221 = shalt.err (!%p2218_p2)
}
  0x69   : > { %s2222_s17 = scalar_lea.vmem %s2914_s7, 128  ;;  %s2652_s6 = smov [#allocation5]  }
  0x6a   : > { %p2223_p3 = scmp.ne.s32.totalorder %s2914_s7, %s2222_s17  ;;  %s2227_s13 = sshll.u32 %s2652_s6, 4  ;;  %s2228_s13 = int_to_ptr.vmem [resolvable:$false] %s2227_s13 }
  0x6b   : > { %s2229_s11 = scalar_lea.vmem %s2228_s13, 256  ;;  %p2230_p10 = scmp.lt.s32.totalorder %s2914_s7, %s2228_s13 }
  0x6c   : > { %p2225_p9 = pnand %p2223_p3, %p2921_p7  ;;  %p2231_p0 = scmp.lt.s32.totalorder %s2229_s11, %s2222_s17 }
  0x6e   : > { %p2226_p5 = pneg %p2225_p9  ;;  %p2232_p13 = por %p2231_p0, %p2230_p10 }
  0x70   : > { %p2233_p1 = pnand %p2232_p13, %p2226_p5 }
  0x72   : > { %2236 = shalt.err (!%p2233_p1)
}
  0x73   : > { %s3575_s15 = scalar_lea.sflag [#allocation6], %s2883_s26  ;;  %s3576_s1 = sld [smem:[#allocation46_spill]] }
  0x74   : > { %2005 = dma.hbm_to_vmem [thread:$0]  (!%p2910_p12), %s2905_s9, 128, %s2914_s7, %s3575_s15  }
  0x75   : > { %s471_s17 = scalar_lea.vmem [#allocation8], %s2896_s18 }
  0x76   : > { %s478_s13 = sshll.u32 %s471_s17, 4  ;;  %s479_s13 = int_to_ptr.vmem [resolvable:$true] %s478_s13 }
  0x79   : > { %s2950_s6 = scalar_lea.hbm %s3576_s1, %s2899_s12  ;;  %s2242_s9 = scalar_lea.hbm %s3576_s1, 256 }
  0x7a   : > { %s2237_s0 = scalar_lea.hbm %s2950_s6, 128  ;;  %p2243_p4 = scmp.lt.u32.totalorder %s2950_s6, %s3576_s1 }
  0x7b   : > { %p2238_p0 = scmp.ne.s32.totalorder %s2950_s6, %s2237_s0  ;;  %p2244_p10 = scmp.lt.u32.totalorder %s2242_s9, %s2237_s0 }
  0x7c   : > { %p2246_p6 = scmp.lt.u32.totalorder %s2237_s0, %s2950_s6 }
  0x7d   : > { %p2240_p5 = pnand %p2238_p0, %p2921_p7  ;;  %p2245_p11 = por %p2244_p10, %p2243_p4 }
  0x7f   : > { %p2241_p2 = pneg %p2240_p5  ;;  %p2247_p8 = por %p2246_p6, %p2245_p11 }
  0x81   : > { %p2248_p3 = pnand %p2247_p8, %p2241_p2 }
  0x83   : > { %2251 = shalt.err (!%p2248_p3)
}
  0x84   : > { %s2252_s23 = scalar_lea.vmem %s479_s13, 128  ;;  %s2653_s17 = smov [#allocation8]  }
  0x85   : > { %p2253_p9 = scmp.ne.s32.totalorder %s479_s13, %s2252_s23  ;;  %s2257_s11 = sshll.u32 %s2653_s17, 4  ;;  %s2258_s11 = int_to_ptr.vmem [resolvable:$false] %s2257_s11 }
  0x86   : > { %s2259_s27 = scalar_lea.vmem %s2258_s11, 256  ;;  %p2260_p0 = scmp.lt.s32.totalorder %s479_s13, %s2258_s11 }
  0x87   : > { %p2255_p13 = pnand %p2253_p9, %p2921_p7  ;;  %p2261_p5 = scmp.lt.s32.totalorder %s2259_s27, %s2252_s23 }
  0x89   : > { %p2256_p1 = pneg %p2255_p13  ;;  %p2262_p12 = por %p2261_p5, %p2260_p0 }
  0x8b   : > { %p2263_p4 = pnand %p2262_p12, %p2256_p1 }
  0x8d   : > { %2266 = shalt.err (!%p2263_p4)
}
  0x8e   : > { %p3577_p10 = scmp.ne.s32.totalorder %s3573_s14, 0  ;;  %s3578_s0 = scalar_lea.sflag [#allocation9], %s2883_s26 }
  0x8f   : > { %s3579_s3 = sld [smem:[#allocation48_spill]]  ;;  %s507_s11 = scalar_lea.vmem [#allocation11], %s2896_s18 }
  0x90   : > { %2008 = dma.hbm_to_vmem [thread:$0]  (!%p3577_p10), %s2950_s6, 128, %s479_s13, %s3578_s0  }
  0x91   : > { %s514_s24 = sshll.u32 %s507_s11, 4  ;;  %s2654_s23 = smov [#allocation17]   ;;  %s2980_s24 = int_to_ptr.vmem [resolvable:$true] %s514_s24 }
  0x92   : > { %s2982_s17 = sshll.u32 %s2654_s23, 4  ;;  %s504_s27 = scalar_lea.sflag [#allocation12], %s2883_s26  ;;  %s430_s17 = int_to_ptr.vmem [resolvable:$true] %s2982_s17 }
  0x95   : > { %s2977_s15 = scalar_lea.hbm %s3579_s3, %s2899_s12  ;;  %s2272_s0 = scalar_lea.hbm %s3579_s3, 256 }
  0x96   : > { %s2267_s1 = scalar_lea.hbm %s2977_s15, 128  ;;  %p2273_p6 = scmp.lt.u32.totalorder %s2977_s15, %s3579_s3 }
  0x97   : > { %p2268_p12 = scmp.ne.s32.totalorder %s2977_s15, %s2267_s1  ;;  %p2274_p8 = scmp.lt.u32.totalorder %s2272_s0, %s2267_s1 }
  0x98   : > { %p2276_p9 = scmp.lt.u32.totalorder %s2267_s1, %s2977_s15 }
  0x99   : > { %p2270_p2 = pnand %p2268_p12, %p2921_p7  ;;  %p2275_p3 = por %p2274_p8, %p2273_p6 }
  0x9b   : > { %p2271_p11 = pneg %p2270_p2  ;;  %p2277_p13 = por %p2276_p9, %p2275_p3 }
  0x9d   : > { %p2278_p1 = pnand %p2277_p13, %p2271_p11 }
  0x9f   : > { %2281 = shalt.err (!%p2278_p1)
}
  0xa0   : > { %s2282_s11 = scalar_lea.vmem %s2980_s24, 128  ;;  %s2655_s23 = smov [#allocation11]  }
  0xa1   : > { %p2283_p0 = scmp.ne.s32.totalorder %s2980_s24, %s2282_s11  ;;  %s2287_s6 = sshll.u32 %s2655_s23, 4  ;;  %s2288_s6 = int_to_ptr.vmem [resolvable:$false] %s2287_s6 }
  0xa2   : > { %s2289_s13 = scalar_lea.vmem %s2288_s6, 256  ;;  %p2290_p12 = scmp.lt.s32.totalorder %s2980_s24, %s2288_s6 }
  0xa3   : > { %p2285_p5 = pnand %p2283_p0, %p2921_p7  ;;  %p2291_p2 = scmp.lt.s32.totalorder %s2289_s13, %s2282_s11 }
  0xa5   : > { %p2286_p4 = pneg %p2285_p5  ;;  %p2292_p6 = por %p2291_p2, %p2290_p12 }
  0xa7   : > { %p2293_p8 = pnand %p2292_p6, %p2286_p4 }
  0xa9   : > { %2296 = shalt.err (!%p2293_p8)
}
  0xaa   : > { %2014 = dma.hbm_to_vmem [thread:$0]  (!%p3577_p10), %s2977_s15, 128, %s2980_s24, %s504_s27  }
  0xab   : > { %s3580_s8 = sld [smem:[#allocation53_spill]]  ;;  %p3581_p3 = scmp.ne.s32.totalorder %s3567_s25, 0 }
  0xad   : > { %p3582_p9 = pneg %p3581_p3 }
  0xb1   : > { %s2297_s7 = scalar_lea.hbm %s3580_s8, 512 }
  0xb2   : > { %p2298_p11 = scmp.ne.s32.totalorder %s3580_s8, %s2297_s7  ;;  %p2304_p0 = scmp.lt.u32.totalorder %s2297_s7, %s3580_s8 }
  0xb4   : > { %p2300_p13 = pnand %p2298_p11, %p3582_p9 }
  0xb6   : > { %p2301_p1 = pneg %p2300_p13 }
  0xb8   : > { %p2306_p5 = pnand %p2304_p0, %p2301_p1 }
  0xba   : > { %2309 = shalt.err (!%p2306_p5)
}
  0xbb   : > { %s2310_s15 = scalar_lea.vmem %s430_s17, 512  ;;  %p3583_p12 = pmov %p3582_p9 }
  0xbc   : > { %p2311_p4 = scmp.ne.s32.totalorder %s430_s17, %s2310_s15  ;;  %p2318_p8 = scmp.lt.s32.totalorder %s430_s17, %s430_s17 }
  0xbd   : > { %p2319_p10 = scmp.lt.s32.totalorder %s2310_s15, %s2310_s15 }
  0xbe   : > { %p2313_p2 = pnand %p2311_p4, %p3583_p12 }
  0xbf   : > { %p2320_p7 = por %p2319_p10, %p2318_p8 }
  0xc0   : > { %p2314_p6 = pneg %p2313_p2 }
  0xc2   : > { %p2321_p9 = pnand %p2320_p7, %p2314_p6 }
  0xc4   : > { %2324 = shalt.err (!%p2321_p9)
}
  0xc5   : > { %s3584_s24 = smov 8   ;;  %s3585_s13 = smov 128  }
  0xc6   : > { %2001 = dma.hbm_to_vmem [thread:$0]  (!%p3581_p3), %s3580_s8, 512, %s430_s17, [#allocation18], %s3585_s13, %s3585_s13, %s3584_s24  }
  0xc7   : > { %s3586_s2 = sld [smem:[#allocation47_spill]]  ;;  %s489_s25 = scalar_lea.vmem [#allocation10], %s2896_s18 }
  0xc8   : > { %s496_s11 = sshll.u32 %s489_s25, 4  ;;  %p3587_p10 = scmp.ne.s32.totalorder %s3574_s10, 0  ;;  %s497_s11 = int_to_ptr.vmem [resolvable:$true] %s496_s11 }
  0xcd   : > { %s3036_s23 = scalar_lea.hbm %s3586_s2, %s2899_s12  ;;  %s2330_s17 = scalar_lea.hbm %s3586_s2, 256 }
  0xce   : > { %s2325_s6 = scalar_lea.hbm %s3036_s23, 128  ;;  %p2331_p3 = scmp.lt.u32.totalorder %s3036_s23, %s3586_s2 }
  0xcf   : > { %p2326_p7 = scmp.ne.s32.totalorder %s3036_s23, %s2325_s6  ;;  %p2332_p1 = scmp.lt.u32.totalorder %s2330_s17, %s2325_s6 }
  0xd0   : > { %p2334_p5 = scmp.lt.u32.totalorder %s2325_s6, %s3036_s23 }
  0xd1   : > { %p2328_p11 = pnand %p2326_p7, %p3587_p10  ;;  %p2333_p0 = por %p2332_p1, %p2331_p3 }
  0xd3   : > { %p2329_p13 = pneg %p2328_p11  ;;  %p2335_p4 = por %p2334_p5, %p2333_p0 }
  0xd5   : > { %p2336_p12 = pnand %p2335_p4, %p2329_p13 }
  0xd7   : > { %2339 = shalt.err (!%p2336_p12)
}
  0xd8   : > { %s2340_s0 = scalar_lea.vmem %s497_s11, 128  ;;  %s2656_s7 = smov [#allocation10]  }
  0xd9   : > { %p2341_p2 = scmp.ne.s32.totalorder %s497_s11, %s2340_s0  ;;  %s2345_s9 = sshll.u32 %s2656_s7, 4  ;;  %s2346_s9 = int_to_ptr.vmem [resolvable:$false] %s2345_s9 }
  0xda   : > { %s2347_s25 = scalar_lea.vmem %s2346_s9, 256  ;;  %p2348_p9 = scmp.lt.s32.totalorder %s497_s11, %s2346_s9 }
  0xdb   : > { %p2343_p6 = pnand %p2341_p2, %p3587_p10  ;;  %p2349_p7 = scmp.lt.s32.totalorder %s2347_s25, %s2340_s0 }
  0xdd   : > { %p2344_p8 = pneg %p2343_p6  ;;  %p2350_p11 = por %p2349_p7, %p2348_p9 }
  0xdf   : > { %p2351_p1 = pnand %p2350_p11, %p2344_p8 }
  0xe1   : > { %2354 = shalt.err (!%p2351_p1)
}
  0xe2   : > { %p3588_p3 = scmp.ne.s32.totalorder %s3573_s14, 0  ;;  %s3589_s6 = scalar_lea.sflag [#allocation9], %s2883_s26 }
  0xe3   : > { %s3590_s4 = sld [smem:[#allocation49_spill]]  ;;  %s525_s24 = scalar_lea.vmem [#allocation13], %s2896_s18 }
  0xe4   : > { %2011 = dma.hbm_to_vmem [thread:$0]  (!%p3588_p3), %s3036_s23, 128, %s497_s11, %s3589_s6  }
  0xe5   : > { %s532_s13 = sshll.u32 %s525_s24, 4  ;;  %s533_s13 = int_to_ptr.vmem [resolvable:$true] %s532_s13 }
  0xe9   : > { %s3062_s17 = scalar_lea.hbm %s3590_s4, %s2899_s12  ;;  %s2360_s23 = scalar_lea.hbm %s3590_s4, 256 }
  0xea   : > { %s2355_s0 = scalar_lea.hbm %s3062_s17, 128  ;;  %p2361_p4 = scmp.lt.u32.totalorder %s3062_s17, %s3590_s4 }
  0xeb   : > { %p2356_p13 = scmp.ne.s32.totalorder %s3062_s17, %s2355_s0  ;;  %p2362_p12 = scmp.lt.u32.totalorder %s2360_s23, %s2355_s0 }
  0xec   : > { %p2364_p6 = scmp.lt.u32.totalorder %s2355_s0, %s3062_s17 }
  0xed   : > { %p2358_p0 = pnand %p2356_p13, %p3587_p10  ;;  %p2363_p2 = por %p2362_p12, %p2361_p4 }
  0xef   : > { %p2359_p5 = pneg %p2358_p0  ;;  %p2365_p8 = por %p2364_p6, %p2363_p2 }
  0xf1   : > { %p2366_p9 = pnand %p2365_p8, %p2359_p5 }
  0xf3   : > { %2369 = shalt.err (!%p2366_p9)
}
  0xf4   : > { %s2370_s18 = scalar_lea.vmem %s533_s13, 128  ;;  %s2657_s12 = smov [#allocation13]  }
  0xf5   : > { %p2371_p7 = scmp.ne.s32.totalorder %s533_s13, %s2370_s18  ;;  %s2375_s6 = sshll.u32 %s2657_s12, 4  ;;  %s2376_s6 = int_to_ptr.vmem [resolvable:$false] %s2375_s6 }
  0xf6   : > { %s2377_s15 = scalar_lea.vmem %s2376_s6, 256  ;;  %p2378_p13 = scmp.lt.s32.totalorder %s533_s13, %s2376_s6 }
  0xf7   : > { %p2373_p11 = pnand %p2371_p7, %p3587_p10  ;;  %p2379_p0 = scmp.lt.s32.totalorder %s2377_s15, %s2370_s18 }
  0xf9   : > { %p2374_p1 = pneg %p2373_p11  ;;  %p2380_p3 = por %p2379_p0, %p2378_p13 }
  0xfb   : > { %p2381_p4 = pnand %p2380_p3, %p2374_p1 }
  0xfd   : > { %2384 = shalt.err (!%p2381_p4)
}
  0xfe   : > { %p3591_p12 = scmp.ne.s32.totalorder %s3573_s14, 0  ;;  %s3592_s1 = sand.u32 1, %s2627_s16  }
  0xff   : > { %s1841_s24 = sshll.u32 %s3592_s1, 1  ;;  %s1842_s0 = sshll.u32 %s2643_s20, 5 }
 0x100   : > { %2017 = dma.hbm_to_vmem [thread:$0]  (!%p3591_p12), %s3062_s17, 128, %s533_s13, %s504_s27  }
 0x101   : > { %s3593_s5 = sld [smem:[#allocation50_spill]]  ;;  %s543_s11 = scalar_lea.vmem [#allocation14], %s1841_s24 }
 0x102   : > { %s550_s25 = sshll.u32 %s543_s11, 4  ;;  %s540_s18 = scalar_lea.sflag [#allocation15], %s2883_s26  ;;  %s551_s25 = int_to_ptr.vmem [resolvable:$true] %s550_s25 }
 0x107   : > { %s3090_s23 = scalar_lea.hbm %s3593_s5, %s1842_s0  ;;  %s2390_s13 = scalar_lea.hbm %s3593_s5, 64 }
 0x108   : > { %s2385_s12 = scalar_lea.hbm %s3090_s23, 32  ;;  %p2391_p6 = scmp.lt.u32.totalorder %s3090_s23, %s3593_s5 }
 0x109   : > { %p2386_p3 = scmp.ne.s32.totalorder %s3090_s23, %s2385_s12  ;;  %p2392_p8 = scmp.lt.u32.totalorder %s2390_s13, %s2385_s12 }
 0x10a   : > { %p2394_p7 = scmp.lt.u32.totalorder %s2385_s12, %s3090_s23 }
 0x10b   : > { %p2388_p5 = pnand %p2386_p3, %p3587_p10  ;;  %p2393_p9 = por %p2392_p8, %p2391_p6 }
 0x10d   : > { %p2389_p2 = pneg %p2388_p5  ;;  %p2395_p11 = por %p2394_p7, %p2393_p9 }
 0x10f   : > { %p2396_p1 = pnand %p2395_p11, %p2389_p2 }
 0x111   : > { %2399 = shalt.err (!%p2396_p1)
}
 0x112   : > { %s2400_s1 = scalar_lea.vmem %s551_s25, 32  ;;  %s2658_s24 = smov [#allocation14]  }
 0x113   : > { %p2401_p13 = scmp.ne.s32.totalorder %s551_s25, %s2400_s1  ;;  %s2405_s0 = sshll.u32 %s2658_s24, 4  ;;  %s2406_s0 = int_to_ptr.vmem [resolvable:$false] %s2405_s0 }
 0x114   : > { %s2407_s7 = scalar_lea.vmem %s2406_s0, 64  ;;  %p2408_p3 = scmp.lt.s32.totalorder %s551_s25, %s2406_s0 }
 0x115   : > { %p2403_p0 = pnand %p2401_p13, %p3587_p10  ;;  %p2409_p5 = scmp.lt.s32.totalorder %s2407_s7, %s2400_s1 }
 0x117   : > { %p2404_p4 = pneg %p2403_p0  ;;  %p2410_p12 = por %p2409_p5, %p2408_p3 }
 0x119   : > { %p2411_p6 = pnand %p2410_p12, %p2404_p4 }
 0x11b   : > { %2414 = shalt.err (!%p2411_p6)
}
 0x11c   : > { %p3594_p8 = scmp.ne.s32.totalorder %s3573_s14, 0  ;;  %s3595_s10 = sld [smem:[#allocation34_spill]] }
 0x11d   : > { %s52_s9 = sadd.s32 1, %s2639_s19  ;;  %s55_s11 = sadd.s32 1, %s2643_s20 }
 0x11e   : > { %2020 = dma.hbm_to_vmem [thread:$0]  (!%p3594_p8), %s3090_s23, 32, %s551_s25, %s540_s18  }
 0x11f   : > { %p53_p10 = scmp.ge.s32.totalorder %s52_s9, 4  ;;  %s323_s14 = sadd.s32 1, %s2615_s30 }
 0x120   : > { %p330_p12 = scmp.ne.s32.totalorder %s2615_s30, %s2611_s29  ;;  %p336_p2 = scmp.ne.s32.totalorder %s2611_s29, %s2607_s28 }
 0x121   : > { %s3663_s9 = smov (%p53_p10, %s52_s9), 0  ;;  %s3665_s11 = smov (!%p53_p10, %s55_s11), %s2643_s20 }
 0x122   : > { %s320_s12 = ssub.s32 %s2639_s19, %s3663_s9  ;;  %p3596_p9 = scmp.eq.s32.totalorder %s2647_s21, 0 }
 0x123   : > { %p57_p11 = scmp.ge.s32.totalorder %s3665_s11, 2  ;;  %p321_p1 = scmp.eq.s32.totalorder %s320_s12, 0 }
 0x124   : > { %p3124_p7 = por %p330_p12, %p3596_p9  ;;  %p3598_p13 = scmp.eq.s32.totalorder %s2807_s22, 0 }
 0x125   : > { %s377_s28 = sadd.s32 1, %s3595_s10  ;;  %s3667_s11 = smov (%p57_p11, %s3665_s11), 0 }
 0x126   : > { %p3130_p0 = por %p336_p2, %p3598_p13  ;;  %s59_s27 = ssub.s32 %s2643_s20, %s3667_s11 }
 0x127   : > { %s3138_s18 = scalar_select %p321_p1, %s2615_s30, %s323_s14  }
 0x128   : > { %s559_s17 = sand.u32 1, %s2615_s30   ;;  %p60_p4 = scmp.eq.s32.totalorder %s59_s27, 0 }
 0x129   : > { %s374_s13 = sor.u32 %s320_s12, %s59_s27  ;;  %s1843_s6 = sshll.u32 %s559_s17, 3 }
 0x12a   : > { %p375_p3 = scmp.eq.s32.totalorder %s374_s13, 0  ;;  %s3600_s15 = sadd.s32 1, %s2627_s16 }
 0x12b   : > { %s3146_s1 = scalar_select %p60_p4, %s2627_s16, %s3600_s15  }
 0x12c   : > { %s3669_s10 = smov (!%p375_p3, %s3595_s10), %s377_s28  ;;  %s1844_s24 = sshll.u32 %s2639_s19, 7 }
 0x12d   : > { %s3601_s2 = sld [smem:[#allocation56_spill]]  ;;  %s561_s14 = scalar_lea.vmem [#allocation19], %s1843_s6 }
 0x12e   : > { %s568_s4 = sshll.u32 %s561_s14, 4  ;;  %p3602_p5 = scmp.lt.s32.totalorder %s2647_s21, 8  ;;  %s3157_s4 = int_to_ptr.vmem [resolvable:$true] %s568_s4 }
 0x130   : > { %p3163_p6 = pnand %p3602_p5, %p3124_p7 }
 0x132   : > { %p2417_p10 = pneg %p3163_p6 }
 0x133   : > { %s3155_s3 = scalar_lea.hbm %s3601_s2, %s1844_s24  ;;  %s2420_s13 = scalar_lea.hbm %s3601_s2, 512 }
 0x134   : > { %s2415_s28 = scalar_lea.hbm %s3155_s3, 128  ;;  %p2421_p9 = scmp.lt.u32.totalorder %s3155_s3, %s3601_s2 }
 0x135   : > { %p2416_p8 = scmp.ne.s32.totalorder %s3155_s3, %s2415_s28  ;;  %p2422_p7 = scmp.lt.u32.totalorder %s2420_s13, %s2415_s28 }
 0x136   : > { %p2424_p1 = scmp.lt.u32.totalorder %s2415_s28, %s3155_s3 }
 0x137   : > { %p2418_p12 = pnand %p2417_p10, %p2416_p8  ;;  %p2423_p11 = por %p2422_p7, %p2421_p9 }
 0x139   : > { %p2419_p2 = pneg %p2418_p12  ;;  %p2425_p13 = por %p2424_p1, %p2423_p11 }
 0x13b   : > { %p2426_p4 = pnand %p2425_p13, %p2419_p2 }
 0x13d   : > { %2429 = shalt.err (!%p2426_p4)
}
 0x13e   : > { %s2430_s15 = scalar_lea.vmem %s3157_s4, 128  ;;  %s2659_s24 = smov [#allocation19]  }
 0x13f   : > { %p2431_p3 = scmp.ne.s32.totalorder %s3157_s4, %s2430_s15  ;;  %s2435_s0 = sshll.u32 %s2659_s24, 4  ;;  %s2436_s0 = int_to_ptr.vmem [resolvable:$false] %s2435_s0 }
 0x140   : > { %s2437_s7 = scalar_lea.vmem %s2436_s0, 256  ;;  %p2438_p12 = scmp.lt.s32.totalorder %s3157_s4, %s2436_s0 }
 0x141   : > { %p2433_p5 = pnand %p2431_p3, %p2417_p10  ;;  %p2439_p9 = scmp.lt.s32.totalorder %s2437_s7, %s2430_s15 }
 0x143   : > { %p2434_p8 = pneg %p2433_p5  ;;  %p2440_p7 = por %p2439_p9, %p2438_p12 }
 0x145   : > { %p2441_p11 = pnand %p2440_p7, %p2434_p8 }
 0x147   : > { %2444 = shalt.err (!%p2441_p11)
}
 0x148   : > { %s3604_s14 = scalar_lea.sflag [#allocation6], %s2883_s26  ;;  %s3605_s28 = sld [smem:[#allocation43_spill]] }
 0x149   : > { %2023 = dma.hbm_to_vmem [thread:$0]  (!%p3163_p6), %s3155_s3, 128, %s3157_s4, %s3604_s14  }
 0x14e   : > { %p3606_p2 = scmp.ne.s32.totalorder %s3605_s28, 0 }
 0x14f   : > { %s3607_s27 = sld [smem:[#allocation36_spill]] (!%p3606_p2)  ;;  %s3608_s17 = sld [smem:[#allocation39_spill]] (!%p3606_p2) }
 0x150   : > { %577 = sbr.rel (%p3606_p2) target bundleno = 1795 (0x703), region = 68  ;;  %s579_s13 = sand.u32 (!%p3606_p2), 1, %s2807_s22  }
 0x151   : > { %s580_s15 = scalar_lea.sflag (!%p3606_p2), [#allocation6], %s579_s13 }
 0x155   : > { %s3198_s23 = sand.u32 (!%p3606_p2), 1, %s3607_s27   ;;  %p3609_p10 = scmp.ne.s32.totalorder (!%p3606_p2), %s3608_s17, 0 }
 0x156   : > { %s3201_s6 = sshll.u32 (!%p3606_p2), %s3198_s23, 3 }
 0x157   : > { %s3527_s12 = scalar_lea.vmem [#allocation5], %s3201_s6 }
 0x158   : > { %2558 = dma.done.wait (%p3609_p10), %s580_s15, 128  }
 0x159   : > { %2560 = vsyncadd (%p3609_p10), %s580_s15, 4294967168  ;;  %s589_s3 = scalar_lea.sflag [#allocation9], %s579_s13 }
 0x15a   : > { %2562 = dma.done.wait (%p3609_p10), %s589_s3, 256  }
 0x15b   : > { %2564 = vsyncadd (%p3609_p10), %s589_s3, 4294967040  ;;  %s607_s24 = scalar_lea.sflag [#allocation12], %s579_s13  ;;  %s610_s0 = scalar_lea.vmem [#allocation11], %s3201_s6 }
 0x15c   : > { %2566 = dma.done.wait (%p3609_p10), %s607_s24, 256  }
 0x15d   : > { %2568 = vsyncadd (%p3609_p10), %s607_s24, 4294967040  ;;  %s1851_s7 = sshll.u32 %s3198_s23, 1  ;;  %s625_s28 = scalar_lea.sflag [#allocation15], %s579_s13 }
 0x15e   : > { %s3221_s27 = scalar_lea.vmem [#allocation14], %s1851_s7 }
 0x15f   : > { %2570 = dma.done.wait (%p3609_p10), %s625_s28, 32  }
 0x160   : > { %2572 = vsyncadd (%p3609_p10), %s625_s28, 4294967264  ;;  %p3610_p6 = scmp.eq.s32.totalorder %s2807_s22, 0 }
 0x162   : > { %2574 = dma.done.wait (%p3610_p6), [#allocation15], 512   ;;  %p3611_p1 = pmov %p3610_p6 }
 0x164   : > { %2576 = vsyncadd (%p3611_p1), [#allocation15], 4294966784  ;;  %p3612_p13 = pmov %p3611_p1 }
 0x165   : > { %p3613_p4 = pmov %p3611_p1 }
 0x166   : > { %2578 = dma.done.wait (%p3612_p13), [#allocation18], 512  }
 0x167   : > { %2580 = vsyncadd (%p3613_p4), [#allocation18], 4294966784  ;;  %s643_s13 = sand.u32 1, %s2611_s29  }
 0x168   : > { %s3236_s3 = sshll.u32 %s643_s13, 3 }
 0x169   : > { %2582 = dma.done.wait (%p3130_p0), %s580_s15, 128  }
 0x16a   : > { %2584 = vsyncadd (%p3130_p0), %s580_s15, 4294967168  ;;  %s3614_s24 = sld [smem:[#allocation33_spill]]  ;;  %s3249_s22 = scalar_lea.vmem [#allocation20], %s3201_s6 }
 0x16b   : > { %s3615_s13 = sld [smem:[#allocation37_spill]] }
 0x170   : > { %s3526_s7 = sand.u32 1, %s3614_s24  }
 0x171   : > { %s3246_s28 = sshll.u32 %s3526_s7, 3  ;;  %p1857_p3 = scmp.ne.s32.totalorder %s3615_s13, 0 }
 0x172   : > { %v732_v0 = vld [vmem:[%s610_s0] sm:$0xff] (!%p1857_p3)  ;;  %vm761_vm0 = vcmask (!%p1857_p3), 261120   ;;  %s3616_s17 = sld [smem:[#allocation54_spill]] (!%p1857_p3)  ;;  %v729_v2 = vld [vmem:[%s3527_s12] sm:$0xff] (!%p1857_p3)  ;;  %s3618_s0 = scalar_lea.vmem (!%p1857_p3), [#allocation8], %s3201_s6  ;;  %v2660_v10 = vmov (!%p1857_p3), 0  }
 0x173   : > { %728 = sbr.rel (%p1857_p3) target bundleno = 628 (0x274), region = 108  ;;  %1922 = vmatprep.subr.msk.mxu0 (!%p1857_p3), %vm761_vm0, %v732_v0  ;;  %1930 = vmatprep.subr.msk.mxu1 (!%p1857_p3), %vm761_vm0, %v729_v2  ;;  %v730_v4 = vld [vmem:[%s3618_s0] sm:$0xff] (!%p1857_p3)  ;;  %s3619_s25 = sld [smem:[#allocation51_spill]] (!%p1857_p3)  ;;  %v1005_v19 = vld [vmem:[#allocation16 + $0x10] sm:$0xff] (!%p1857_p3)  ;;  %vm998_vm1 = vcmask (!%p1857_p3), 64512  }
 0x174   : > { %1923 = vmatpush3.xpose.msk.msra.mxu0 (!%p1857_p3), %vm761_vm0, %v732_v0  ;;  %1931 = vmatpush3.xpose.msk.msra.mxu1 (!%p1857_p3), %vm761_vm0, %v729_v2  ;;  %s3621_s12 = scalar_lea.vmem (!%p1857_p3), [#allocation10], %s3201_s6  ;;  %s3622_s15 = sld [smem:[#allocation55_spill]] (!%p1857_p3)  ;;  %v1003_v13 = vld [vmem:[#allocation16] sm:$0xff] (!%p1857_p3)  ;;  %v1004_v17 = vld [vmem:[#allocation16 + $0x8] sm:$0xff] (!%p1857_p3)  ;;  %v1117_v22 = vld [vmem:[#allocation17 + $0x10] sm:$0xff] (!%p1857_p3) }
 0x175   : > { %1938 = vmatprep.subr.msk.mxu0 (!%p1857_p3), %vm761_vm0, %v730_v4  ;;  %v731_v7 = vld [vmem:[%s3621_s12] sm:$0xff] (!%p1857_p3)  ;;  %2157 = vset.pattern.permute.xlu0 (!%p1857_p3), %v2660_v10  ;;  %v1115_v16 = vld [vmem:[#allocation17] sm:$0xff] (!%p1857_p3) }
 0x176   : > { %1946 = vmatprep.subr.msk.mxu1 (!%p1857_p3), %vm761_vm0, %v731_v7  ;;  %2158 = vset.pattern.permute.xlu1 (!%p1857_p3), %v2660_v10  ;;  %v1116_v21 = vld [vmem:[#allocation17 + $0x8] sm:$0xff] (!%p1857_p3)  ;;  %v1006_v23 = vld [vmem:[#allocation16 + $0x18] sm:$0xff] (!%p1857_p3) }
 0x177   : > { %v1118_v24 = vld [vmem:[#allocation17 + $0x18] sm:$0xff] (!%p1857_p3) }
 0x178   : > { %s3617_s4 = smov (!%p1857_p3), %s3616_s17  ;;  %v733_v1 = vld [vmem:[%s3616_s17] sm:$0xff] (!%p1857_p3) }
 0x179   : > { %1924 = vmatprep.mubr.msk.f32.mxu0 (!%p1857_p3), %vm761_vm0, %v733_v1  ;;  %v734_v3 = vld [vmem:[%s3617_s4 + $0x8] sm:$0xff] (!%p1857_p3)  ;;  %s3620_s26 = smov (!%p1857_p3), %s3619_s25  ;;  %v890_v5 = vld [vmem:[%s3619_s25] sm:$0xff] (!%p1857_p3)  ;;  %v735_v6 = vld [vmem:[%s3617_s4 + $0x10] sm:$0xff] (!%p1857_p3) }
 0x17a   : > { %1932 = vmatprep.mubr.msk.f32.mxu1 %vm761_vm0, %v890_v5  ;;  %v891_v8 = vld [vmem:[%s3620_s26 + $0x8] sm:$0xff]  ;;  %1925 = vmatmul.mubr.msk.f32.vlgmr.msra.gmra.mrb[0].mxu0 %vm761_vm0, %v734_v3  ;;  %v892_v9 = vld [vmem:[%s3620_s26 + $0x10] sm:$0xff]  ;;  %v736_v11 = vld [vmem:[%s3617_s4 + $0x18] sm:$0xff]  ;;  %s3623_s24 = smov %s3622_s15 }
 0x17b   : > { %1927 = vmatprep.mubr.msk.f32.mxu0 %vm761_vm0, %v735_v6  ;;  %1939 = vmatpush3.xpose.msk.msra.mxu0 %vm761_vm0, %v730_v4  ;;  %v737_v12 = vld [vmem:[%s3622_s15] sm:$0xff]  ;;  %v739_v14 = vld [vmem:[%s3623_s24 + $0x10] sm:$0xff]  ;;  %v893_v15 = vld [vmem:[%s3620_s26 + $0x18] sm:$0xff] }
 0x17c   : > { %1933 = vmatmul.mubr.msk.f32.vlgmr.msra.gmra.mrb[0].mxu1 %vm761_vm0, %v891_v8  ;;  %743 = vperm.xlu0 %2157, %v737_v12   ;;  %v738_v18 = vld [vmem:[%s3623_s24 + $0x8] sm:$0xff]  ;;  %v740_v20 = vld [vmem:[%s3623_s24 + $0x18] sm:$0xff] }
 0x17d   : > { %1947 = vmatpush3.xpose.msk.msra.mxu1 %vm761_vm0, %v731_v7  ;;  %1935 = vmatprep.mubr.msk.f32.mxu1 %vm761_vm0, %v892_v9 }
 0x17e   : > { %1928 = vmatmul.mubr.msk.f32.gmra.mrb[2].mxu0 %vm761_vm0, %v736_v11  ;;  %753 = vperm.xlu1 %2158, %v739_v14  }
 0x17f   : > { %1940 = vmatprep.mubr.msk.f32.mxu0 %vm761_vm0, %v1003_v13 }
 0x180   : > { %1936 = vmatmul.mubr.msk.f32.gmra.mrb[2].mxu1 %vm761_vm0, %v893_v15  ;;  %748 = vperm.xlu0 %2157, %v738_v18  }
 0x181   : > { %1948 = vmatprep.mubr.msk.f32.mxu1 %vm761_vm0, %v1115_v16 }
 0x182   : > { %1941 = vmatmul.mubr.msk.f32.vlgmr.msra.gmra.mrb[4].mxu0 %vm761_vm0, %v1004_v17  ;;  %758 = vperm.xlu1 %2158, %v740_v20  }
 0x183   : > { %1943 = vmatprep.mubr.msk.f32.mxu0 %vm761_vm0, %v1005_v19 }
 0x184   : > { %1949 = vmatmul.mubr.msk.f32.vlgmr.msra.gmra.mrb[4].mxu1 %vm761_vm0, %v1116_v21 }
 0x185   : > { %1951 = vmatprep.mubr.msk.f32.mxu1 %vm761_vm0, %v1117_v22 }
 0x186   : > { %1944 = vmatmul.mubr.msk.f32.gmra.mrb[6].mxu0 %vm761_vm0, %v1006_v23 }
 0x188   : > { %1952 = vmatmul.mubr.msk.f32.gmra.mrb[6].mxu1 %vm761_vm0, %v1118_v24 }
 0x1fb   : > { %v744_v25 = vpop.permute.xlu0 %743 }
 0x1fd   : > { %v754_v26 = vpop.permute.xlu1 %753 }
 0x1ff   : > { %v749_v27 = vpop.permute.xlu0 %748 }
 0x201   : > { %v759_v35 = vpop.permute.xlu1 %758 }
 0x24d   : > { %v1926_v28 = vpop.f32.mrb[0].mxu0 }
 0x24e   : > { %v849_v29 = vadd.f32 %v1926_v28, %v749_v27  ;;  %v843_v30 = vpop.f32.mrb[1].mxu0 }
 0x24f   : > { %v844_v31 = vadd.f32 %v843_v30, %v744_v25  ;;  %v1934_v32 = vpop.f32.mrb[0].mxu1 }
 0x250   : > { %v1864_v33 = vmul.f32 -1.442695, %v849_v29  ;;  %v975_v34 = vpop.f32.mrb[1].mxu1 }
 0x251   : > { %v1863_v36 = vmul.f32 -1.442695, %v844_v31  ;;  %v1929_v37 = vpop.f32.mrb[2].mxu0 }
 0x252   : > { %2159 = vpow2.f32 %v1864_v33  ;;  %v859_v38 = vadd.f32 %v1929_v37, %v759_v35  ;;  %v853_v39 = vpop.f32.mrb[3].mxu0 }
 0x253   : > { %2161 = vpow2.f32 %v1863_v36  ;;  %v854_v40 = vadd.f32 %v853_v39, %v754_v26  ;;  %v1937_v41 = vpop.f32.mrb[2].mxu1 }
 0x254   : > { %v1866_v42 = vmul.f32 -1.442695, %v859_v38  ;;  %v985_v43 = vpop.f32.mrb[3].mxu1 }
 0x255   : > { %v1865_v44 = vmul.f32 -1.442695, %v854_v40  ;;  %v1942_v45 = vpop.f32.mrb[4].mxu0 }
 0x256   : > { %2163 = vpow2.f32 %v1866_v42  ;;  %v1088_v46 = vpop.f32.mrb[5].mxu0 }
 0x257   : > { %2165 = vpow2.f32 %v1865_v44  ;;  %v1950_v47 = vpop.f32.mrb[4].mxu1 }
 0x258   : > { %1220 = vst.msk [vmem:[#allocation4 + $0x8] sm:$0xff] %vm998_vm1, %v1950_v47  ;;  %v1200_v48 = vpop.f32.mrb[5].mxu1 }
 0x259   : > { %1219 = vst.msk [vmem:[#allocation4] sm:$0xff] %vm998_vm1, %v1200_v48  ;;  %v1945_v49 = vpop.f32.mrb[6].mxu0 }
 0x25a   : > { %v1098_v50 = vpop.f32.mrb[7].mxu0 }
 0x25b   : > { %v1953_v51 = vpop.f32.mrb[6].mxu1 }
 0x25c   : > { %v2160_v52 = vpop.eup %2159  ;;  %1222 = vst.msk [vmem:[#allocation4 + $0x18] sm:$0xff] %vm998_vm1, %v1953_v51  ;;  %v1210_v53 = vpop.f32.mrb[7].mxu1 }
 0x25d   : > { %v2162_v54 = vpop.eup %2161  ;;  %v875_v55 = vadd.f32 1.0, %v2160_v52  ;;  %1221 = vst.msk [vmem:[#allocation4 + $0x10] sm:$0xff] %vm998_vm1, %v1210_v53 }
 0x25e   : > { %v874_v56 = vadd.f32 1.0, %v2162_v54 }
 0x25f   : > { %2167 = vrcp.f32 %v875_v55 }
 0x260   : > { %v2164_v57 = vpop.eup %2163  ;;  %2169 = vrcp.f32 %v874_v56 }
 0x261   : > { %v2166_v58 = vpop.eup %2165  ;;  %v877_v59 = vadd.f32 1.0, %v2164_v57 }
 0x262   : > { %v876_v60 = vadd.f32 1.0, %v2166_v58 }
 0x263   : > { %2171 = vrcp.f32 %v877_v59 }
 0x264   : > { %2173 = vrcp.f32 %v876_v60 }
 0x269   : > { %v2168_v61 = vpop.eup %2167 }
 0x26a   : > { %v2170_v62 = vpop.eup %2169  ;;  %v887_v63 = vadd.f32 1.0, %v2168_v61 }
 0x26b   : > { %v886_v0 = vadd.f32 1.0, %v2170_v62 }
 0x26c   : > { %v995_v1 = vmul.f32 %v1934_v32, %v887_v63  ;;  %v1108_v2 = vmul.f32 %v1942_v45, %v887_v63 }
 0x26d   : > { %v2172_v3 = vpop.eup %2171  ;;  %v994_v4 = vmul.f32 %v975_v34, %v886_v0  ;;  %v1107_v5 = vmul.f32 %v1088_v46, %v886_v0 }
 0x26e   : > { %v2174_v6 = vpop.eup %2173  ;;  %1000 = vst.msk [vmem:[#allocation2 + $0x8] sm:$0xff] %vm998_vm1, %v995_v1  ;;  %v889_v7 = vadd.f32 1.0, %v2172_v3  ;;  %1112 = vst.msk [vmem:[#allocation3 + $0x8] sm:$0xff] %vm998_vm1, %v1108_v2 }
 0x26f   : > { %999 = vst.msk [vmem:[#allocation2] sm:$0xff] %vm998_vm1, %v994_v4  ;;  %v888_v8 = vadd.f32 1.0, %v2174_v6  ;;  %1111 = vst.msk [vmem:[#allocation3] sm:$0xff] %vm998_vm1, %v1107_v5 }
 0x270   : > { %v997_v9 = vmul.f32 %v1937_v41, %v889_v7  ;;  %v1110_v10 = vmul.f32 %v1945_v49, %v889_v7 }
 0x271   : > { %v996_v11 = vmul.f32 %v985_v43, %v888_v8  ;;  %v1109_v12 = vmul.f32 %v1098_v50, %v888_v8 }
 0x272   : > { %1002 = vst.msk [vmem:[#allocation2 + $0x18] sm:$0xff] %vm998_vm1, %v997_v9  ;;  %1114 = vst.msk [vmem:[#allocation3 + $0x18] sm:$0xff] %vm998_vm1, %v1110_v10 }
 0x273   : > { %1001 = vst.msk [vmem:[#allocation2 + $0x10] sm:$0xff] %vm998_vm1, %v996_v11  ;;  %1113 = vst.msk [vmem:[#allocation3 + $0x10] sm:$0xff] %vm998_vm1, %v1109_v12 }
 0x274 PF: > { %s3624_s13 = sld [smem:[#allocation37_spill]]  ;;  %v2661_v13 = vmov 0.0   ;;  %vm2662_vm2 = vmmov 0   ;;  %vm1262_vm3 = vcmask 64512   ;;  %v1339_v17 = vld [vmem:[%s3221_s27] sm:$0x3] }
 0x275   : > { %1954 = vmatprep.subr.mxu0 %v2661_v13  ;;  %1956 = vmatprep.mubr.msk.f32.mxu0 %vm2662_vm2, %v2661_v13  ;;  %vm1340_vm4 = vnez %v1339_v17  ;;  %v2663_v18 = vmov 0   ;;  %s3625_s12 = scalar_lea.vmem [#allocation13], %s3201_s6  ;;  %s3626_s25 = scalar_lea.vmem [#allocation19], %s3236_s3  ;;  %vm1512_vm6 = vcmask (!%p1857_p3), 261120  }
 0x276   : > { %1959 = vmatprep.subr.mxu1 %v2661_v13  ;;  %1961 = vmatprep.mubr.msk.f32.mxu1 %vm2662_vm2, %v2661_v13  ;;  %v1341_v19 = vsel %vm1340_vm4, 16843009, %v2663_v18  ;;  %v1337_v22 = vld [vmem:[%s3625_s12] sm:$0xff]  ;;  %v1433_v34 = vld [vmem:[%s3626_s25] sm:$0xff]  ;;  %s3627_s17 = scalar_lea.vmem [#allocation21], %s3246_s28  ;;  %s3628_s3 = scalar_lea.vmem (!%p1857_p3), [#allocation5], %s3201_s6 }
 0x277   : > { %v1342_v20 = vunpack.c.0.s8 %v1341_v19  ;;  %v1510_v42 = vld [vmem:[%s3628_s3] sm:$0xff] (!%p1857_p3) }
 0x279   : > { %vm1343_vm5 = vcmp.ne.s32.totalorder %v1342_v20, 0 }
 0x27a   : > { %s3334_s14 = sshll.u32 %s3624_s13, 3 }
 0x27b   : > { %s1224_s7 = scalar_lea.vmem [#allocation2], %s3334_s14  ;;  %s1226_s0 = scalar_lea.vmem [#allocation3], %s3334_s14 }
 0x27c   : > { %v1225_v14 = vld [vmem:[%s1224_s7] sm:$0xff]  ;;  %s1228_s27 = scalar_lea.vmem [#allocation4], %s3334_s14 }
 0x27d   : > { %v1227_v15 = vld [vmem:[%s1226_s0] sm:$0xff]  ;;  %1230 = vxpose.xlu0.b32.start.end [1/1] (short) (narrow) %v1225_v14, 8 }
 0x27e   : > { %1955 = vmatpush3.msra.mxu0 %v1227_v15  ;;  %v1229_v33 = vld [vmem:[%s1228_s27] sm:$0xff] }
 0x27f   : > { %1964 = vmatprep.subr.mxu0 %v2661_v13  ;;  %1960 = vmatpush3.xpose.msk.msra.mxu1 %vm1262_vm3, %v1229_v33 }
 0x2fd   : > { %v1246_v16 = vpop.trf.xlu0 }
 0x2fe   : > { %1957 = vmatmul.mubr.msk.f32.vlgmr.msra.gmra.mrb[0].mxu0 %vm1262_vm3, %v1246_v16 }
 0x2ff   : > { %1966 = vmatprep.mubr.msk.f32.mxu0 %vm2662_vm2, %v2661_v13  ;;  %1965 = vmatpush3.msra.mxu0 %v1433_v34 }
 0x3d1   : > { %v1332_v21 = vpop.f32.mrb[0].mxu0 }
 0x3d2   : > { %v1336_v23 = vmul.f32 0.35355338, %v1332_v21  ;;  %v1958_v24 = vpop.f32.mrb[1].mxu0 }
 0x3d4   : > { %v1338_v25 = vmul.f32 %v1337_v22, %v1336_v23 }
 0x3d6   : > { %v1344_v26 = vsel %vm1343_vm5, -1e+10, %v1338_v25 }
 0x3d7   : > { %v1345_v27 = vsel %vm1262_vm3, %v1344_v26, -inf }
 0x3d8   : > { %1346 = vmax.xlane.f32.xlu0 %v1345_v27 }
 0x465   : > { %v1347_v28 = vpop.xlane.xlu0 %1346 }
 0x466   : > { %v1348_v29 = vsub.f32 %v1344_v26, %v1347_v28 }
 0x468   : > { %v1349_v30 = vmul.f32 1.442695, %v1348_v29 }
 0x46a   : > { %2175 = vpow2.f32 %v1349_v30 }
 0x474   : > { %v2176_v31 = vpop.eup %2175 }
 0x475   : > { %v1351_v32 = vsel %vm1262_vm3, %v2176_v31, 0.0 }
 0x476   : > { %1352 = vadd.xlane.f32.xlu1 %v1351_v32 }
 0x503   : > { %v1353_v35 = vpop.xlane.xlu1 %1352 }
 0x504   : > { %2177 = vrcp.f32 %v1353_v35 }
 0x50e   : > { %v2178_v36 = vpop.eup %2177 }
 0x50f   : > { %v1355_v37 = vmul.f32 %v2178_v36, %v2176_v31 }
 0x511   : > { %1356 = vst.msk [vmem:[%s3627_s17] sm:$0xff] %vm1262_vm3, %v1355_v37  ;;  %1962 = vmatmul.mubr.msk.f32.vlgmr.msra.gmra.mrb[0].mxu1 %vm1262_vm3, %v1355_v37 }
 0x5e4   : > { %v1429_v38 = vpop.f32.mrb[0].mxu1 }
 0x5e5   : > { %v1963_v39 = vpop.f32.mrb[1].mxu1  ;;  %1967 = vmatmul.mubr.msk.f32.vlgmr.msra.gmra.mrb[2].mxu0 %vm1262_vm3, %v1429_v38 }
 0x6b3   : > { %1509 = sbr.rel (%p1857_p3) target bundleno = 1724 (0x6bc), region = 112 }
 0x6b8   : > { %v1503_v40 = vpop.f32.mrb[2].mxu0 }
 0x6b9   : > { %v1968_v41 = vpop.f32.mrb[3].mxu0  ;;  %v1511_v43 = vadd.f32 (!%p1857_p3), %v1510_v42, %v1503_v40 }
 0x6bb   : > { %1513 = vst.msk [vmem:[%s3249_s22] sm:$0xff] %vm1512_vm6, %v1511_v43 }
 0x6bc PF: > { %s3629_s15 = sld [smem:[#allocation37_spill]] }
 0x6c2   : > { %p1888_p0 = scmp.eq.s32.totalorder %s3629_s15, 0 }
 0x6c3   : > { %v1518_v44 = vld [vmem:[%s3249_s22] sm:$0xff] (!%p1888_p0)  ;;  %vm1520_vm7 = vcmask (!%p1888_p0), 261120  }
 0x6c4   : > { %1517 = sbr.rel (%p1888_p0) target bundleno = 1739 (0x6cb), region = 116  ;;  %v1519_v45 = vadd.f32 (!%p1888_p0), %v1518_v44, %v1503_v40 }
 0x6c6   : > { %1521 = vst.msk [vmem:[%s3249_s22] sm:$0xff] (!%p1888_p0), %vm1520_vm7, %v1519_v45 }
 0x6cb PF: > { %s3630_s13 = sld [smem:[#allocation38_spill]]  ;;  %s3631_s6 = sld [smem:[#allocation44_spill]] }
 0x6cc   : > { %s3632_s12 = sld [smem:[#allocation57_spill]]  ;;  %s1541_s25 = sshll.u32 %s3249_s22, 4  ;;  %s1542_s25 = int_to_ptr.vmem [resolvable:$true] %s1541_s25 }
 0x6cd   : > { %s1523_s17 = scalar_lea.sflag [#allocation7], %s3198_s23  ;;  %s2445_s3 = scalar_lea.vmem %s1542_s25, 128 }
 0x6ce   : > { %p2446_p5 = scmp.ne.s32.totalorder %s1542_s25, %s2445_s3  ;;  %s2664_s15 = smov [#allocation20]  }
 0x6cf   : > { %s2449_s2 = sshll.u32 %s2664_s15, 4  ;;  %s2450_s2 = int_to_ptr.vmem [resolvable:$false] %s2449_s2 }
 0x6d0   : > { %s2451_s4 = scalar_lea.vmem %s2450_s2, 256  ;;  %p2452_p7 = scmp.lt.s32.totalorder %s1542_s25, %s2450_s2 }
 0x6d1   : > { %s1891_s14 = sshll.u32 %s3630_s13, 7  ;;  %p3633_p8 = scmp.ne.s32.totalorder %s3631_s6, 0 }
 0x6d2   : > { %s3365_s27 = scalar_lea.hbm %s3632_s12, %s1891_s14  ;;  %p2453_p11 = scmp.lt.s32.totalorder %s2451_s4, %s2445_s3 }
 0x6d3   : > { %p2447_p12 = pnand %p2446_p5, %p3633_p8 }
 0x6d4   : > { %p2454_p2 = por %p2453_p11, %p2452_p7 }
 0x6d5   : > { %p2448_p9 = pneg %p2447_p12 }
 0x6d7   : > { %p2455_p10 = pnand %p2454_p2, %p2448_p9 }
 0x6d9   : > { %2458 = shalt.err (!%p2455_p10)
}
 0x6da   : > { %s2459_s23 = scalar_lea.hbm %s3365_s27, 128  ;;  %s2463_s7 = scalar_lea.hbm %s3632_s12, 256 }
 0x6db   : > { %p2460_p6 = scmp.ne.s32.totalorder %s3365_s27, %s2459_s23  ;;  %p2464_p4 = scmp.lt.u32.totalorder %s3365_s27, %s3632_s12 }
 0x6dc   : > { %p2465_p3 = scmp.lt.u32.totalorder %s2463_s7, %s2459_s23  ;;  %p2467_p5 = scmp.lt.u32.totalorder %s2459_s23, %s3365_s27 }
 0x6dd   : > { %p2461_p1 = pnand %p2460_p6, %p3633_p8 }
 0x6de   : > { %p2466_p0 = por %p2465_p3, %p2464_p4 }
 0x6df   : > { %p2462_p13 = pneg %p2461_p1 }
 0x6e0   : > { %p2468_p12 = por %p2467_p5, %p2466_p0 }
 0x6e2   : > { %p2469_p9 = pnand %p2468_p12, %p2462_p13 }
 0x6e4   : > { %2472 = shalt.err (!%p2469_p9)
}
 0x6e5   : > { %s3634_s4 = sld [smem:[#allocation37_spill]]  ;;  %s3635_s3 = sld [smem:[#allocation33_spill]] }
 0x6e6   : > { %s3636_s15 = sld [smem:[#allocation41_spill]]  ;;  %s1892_s22 = sshll.u32 %s3630_s13, 2 }
 0x6e7   : > { %1991 = dma.vmem_to_hbm [thread:$0]  (%p3633_p8), %s1542_s25, 128, %s3365_s27, %s1523_s17  }
 0x6e8   : > { %s3637_s14 = scalar_lea.vmem [#allocation21], %s3246_s28  ;;  %s3638_s6 = sld [smem:[#allocation58_spill]] }
 0x6e9   : > { %s1556_s5 = sshll.u32 %s3637_s14, 4  ;;  %s2665_s28 = smov [#allocation21]   ;;  %s3390_s5 = int_to_ptr.vmem [resolvable:$true] %s1556_s5 }
 0x6ea   : > { %s2473_s26 = scalar_lea.vmem %s3390_s5, 128  ;;  %s2477_s13 = sshll.u32 %s2665_s28, 4  ;;  %s2478_s13 = int_to_ptr.vmem [resolvable:$false] %s2477_s13 }
 0x6eb   : > { %s1552_s0 = sadd.s32 %s3634_s4, %s1892_s22  ;;  %s3639_s12 = sand.u32 1, %s3635_s3  }
 0x6ec   : > { %s1893_s23 = sshll.u32 %s1552_s0, 7  ;;  %s1528_s24 = scalar_lea.sflag [#allocation22], %s3639_s12 }
 0x6ed   : > { %p2474_p7 = scmp.ne.s32.totalorder %s3390_s5, %s2473_s26  ;;  %p3640_p11 = scmp.ne.s32.totalorder %s3636_s15, 0 }
 0x6ee   : > { %s1554_s8 = scalar_lea.hbm %s3638_s6, %s1893_s23  ;;  %s2479_s27 = scalar_lea.vmem %s2478_s13, 256 }
 0x6ef   : > { %p2475_p8 = pnand %p2474_p7, %p3640_p11  ;;  %p2480_p10 = scmp.lt.s32.totalorder %s3390_s5, %s2478_s13 }
 0x6f0   : > { %p2481_p6 = scmp.lt.s32.totalorder %s2479_s27, %s2473_s26 }
 0x6f1   : > { %p2476_p2 = pneg %p2475_p8 }
 0x6f2   : > { %p2482_p1 = por %p2481_p6, %p2480_p10 }
 0x6f4   : > { %p2483_p13 = pnand %p2482_p1, %p2476_p2 }
 0x6f6   : > { %2486 = shalt.err (!%p2483_p13)
}
 0x6f7   : > { %s2487_s25 = scalar_lea.hbm %s1554_s8, 128  ;;  %s2491_s4 = scalar_lea.hbm %s3638_s6, 1024 }
 0x6f8   : > { %p2488_p4 = scmp.ne.s32.totalorder %s1554_s8, %s2487_s25  ;;  %p2492_p5 = scmp.lt.u32.totalorder %s1554_s8, %s3638_s6 }
 0x6f9   : > { %p2493_p12 = scmp.lt.u32.totalorder %s2491_s4, %s2487_s25  ;;  %p2495_p7 = scmp.lt.u32.totalorder %s2487_s25, %s1554_s8 }
 0x6fa   : > { %p2489_p3 = pnand %p2488_p4, %p3640_p11 }
 0x6fb   : > { %p2494_p9 = por %p2493_p12, %p2492_p5 }
 0x6fc   : > { %p2490_p0 = pneg %p2489_p3 }
 0x6fd   : > { %p2496_p8 = por %p2495_p7, %p2494_p9 }
 0x6ff   : > { %p2497_p2 = pnand %p2496_p8, %p2490_p0 }
 0x701   : > { %2500 = shalt.err (!%p2497_p2)
}
 0x702   : > { %1992 = dma.vmem_to_hbm [thread:$0]  (%p3640_p11), %s3390_s5, 128, %s1554_s8, %s1528_s24  }
 0x703 PF: > { %s3641_s26 = sld [smem:[#allocation35_spill]]  ;;  %s3642_s14 = sld [smem:[#allocation40_spill]] }
 0x704   : > { %p2036_p10 = scmp.ge.s32.totalorder %s2647_s21, 2 }
 0x709   : > { %s1568_s0 = sand.u32 1, %s3641_s26   ;;  %p3643_p6 = scmp.ne.s32.totalorder %s3642_s14, 0 }
 0x70a   : > { %s1569_s23 = scalar_lea.sflag [#allocation7], %s1568_s0 }
 0x70b   : > { %p2025_p1 = pnand %p2036_p10, %p3643_p6 }
 0x70d   : > { %2586 = dma.done.wait (!%p2025_p1), %s1569_s23, 128  }
 0x70e   : > { %2588 = vsyncadd (!%p2025_p1), %s1569_s23, 4294967168  ;;  %s3644_s7 = sld [smem:[#allocation32_spill]]  ;;  %s3645_s2 = sld [smem:[#allocation42_spill]] }
 0x714   : > { %s1577_s28 = sand.u32 1, %s3644_s7   ;;  %p3646_p13 = scmp.ne.s32.totalorder %s3645_s2, 0 }
 0x715   : > { %s1578_s13 = scalar_lea.sflag [#allocation22], %s1577_s28 }
 0x716   : > { %p2028_p4 = pnand %p2036_p10, %p3646_p13 }
 0x718   : > { %2590 = dma.done.wait (!%p2028_p4), %s1578_s13, 128  }
 0x719   : > { %2592 = vsyncadd (!%p2028_p4), %s1578_s13, 4294967168  ;;  %s43_s21 = sadd.s32 1, %s2647_s21   ;;  %s3648_s25 = sld [smem:[#allocation33_spill]] }
 0x71a   : > { %p3421_p11 = scmp.ge.s32.totalorder %s43_s21, 10   ;;  %s3649_s26 = sld [smem:[#allocation34_spill]] }
 0x71b   : > { %s3650_s14 = sld [smem:[#allocation36_spill]]  ;;  %s3652_s27 = smov %s3669_s10 }
 0x71c   : > { %s3653_s28 = smov %s2611_s29  ;;  %s3654_s29 = smov %s2615_s30 }
 0x71d   : > { %s3655_s30 = smov %s3138_s18  ;;  %s3656_s15 = smov %s2627_s16 }
 0x71e   : > { %s3657_s16 = smov %s3146_s1  ;;  %s3658_s17 = smov %s2639_s19 }
 0x71f   : > { %s3659_s18 = smov %s2643_s20  ;;  %s3660_s19 = smov %s3663_s9 }
 0x720   : > { %3651 = sst [smem:[#allocation32_spill]] %s3649_s26  ;;  %s3661_s20 = smov %s3667_s11 }
 0x721   :  { %42 = sbr.rel (!%p3421_p11) target bundleno = 35 (0x23), region = 225 }
 0x728   :  { %1583 = vsyncpa [#allocation6], 1 }
 0x729   :  { %1585 = vsyncpa [#allocation6 + $0x1], 1 }
 0x72a   :  { %1586 = vsyncpa [#allocation9], 1 }
 0x72b   :  { %1588 = vsyncpa [#allocation9 + $0x1], 1 }
 0x72c   :  { %1589 = vsyncpa [#allocation12], 1 }
 0x72d   :  { %1591 = vsyncpa [#allocation12 + $0x1], 1 }
 0x72e   :  { %1592 = vsyncpa [#allocation15], 1 }
 0x72f   :  { %1594 = vsyncpa [#allocation15 + $0x1], 1 }
 0x730   :  { %1595 = vsyncpa [#allocation18], 1 }
 0x731   :  { %1596 = vsyncpa [#allocation7], 1 }
 0x732   :  { %1598 = vsyncpa [#allocation7 + $0x1], 1 }
 0x733   :  { %1599 = vsyncpa [#allocation22], 1 }
 0x734   :  { %1601 = vsyncpa [#allocation22 + $0x1], 1 }

</bundles_post_ra>
